<compile_context>
chip_gen: v6e
topology: v6e:2x2x1
jax: 0.10.0
libtpu: 0.0.40
codegen_flags: <defaults>
</compile_context>

<pallas_src>
import functools
from collections import Counter

import jax
import jax.numpy as jnp
import numpy as np
from jax.experimental import pallas as pl
from jax.experimental.pallas import tpu as pltpu

# ---- MS_SSIM_L1_LOSS hyper-parameters (PyTorch module defaults) -------------
GAUSSIAN_SIGMAS = (0.5, 1.0, 2.0, 4.0, 8.0)
DATA_RANGE = 255.0
K1, K2 = 0.01, 0.03
ALPHA = 0.84
COMPENSATION = 200.0
CHANNEL = 3
C1 = (K1 * DATA_RANGE) ** 2
C2 = (K2 * DATA_RANGE) ** 2
PAD = int(2 * GAUSSIAN_SIGMAS[-1])                 # 16
FILTER_SIZE = int(4 * GAUSSIAN_SIGMAS[-1] + 1)     # 33
NUM_SIGMAS = len(GAUSSIAN_SIGMAS)                  # 5
NUM_FILTERS = CHANNEL * NUM_SIGMAS                 # 15

# output channel o -> (input channel = o//5, sigma index = o//3)
OUT_CH_TO_COMBO = [(o // NUM_SIGMAS, o // CHANNEL) for o in range(NUM_FILTERS)]
COMBO_MULT = Counter(OUT_CH_TO_COMBO)                     # multiplicity in PIcs
# lM = prod of l over the LAST `CHANNEL` output channels
LM_MULT = Counter(OUT_CH_TO_COMBO[NUM_FILTERS - CHANNEL:])
# per input channel: which sigma indices are needed (static, sorted)
CH_SIGMAS = tuple(
    tuple(sorted({s for (g, s) in COMBO_MULT if g == ch})) for ch in range(CHANNEL)
)
# product planes per channel: [x, y, x*x, y*y, x*y] (+ mean|x-y| on last channel)
CH_NPLANES = tuple(5 + (1 if ch == CHANNEL - 1 else 0) for ch in range(CHANNEL))


# -------------------------- host-side weight construction --------------------
def _gauss_1d_np(size, sigma):
    coords = np.arange(size, dtype=np.float64) - (size // 2)
    g = np.exp(-(coords ** 2) / (2.0 * sigma ** 2))
    return (g / g.sum()).astype(np.float32)


def _conv_matrix_same_np(g1d, n):
    # "Same" (zero-padded) 1-D conv as a matmul on the UNPADDED signal:
    #   M[i, j] = g1d[j - i + K//2]  if 0 <= j - i + K//2 < K else 0
    # (padded columns of the padded formulation only ever multiply zeros, so
    #  this is exactly equivalent and removes any wrapper-side jnp.pad).
    k = g1d.shape[0]
    idx = np.arange(n)
    d = idx[None, :] - idx[:, None] + k // 2
    valid = (d >= 0) & (d < k)
    return np.where(valid, g1d[np.clip(d, 0, k - 1)], 0.0).astype(np.float32)


@functools.lru_cache(maxsize=None)
def _build_weights_np(H, W):
    g1ds = [_gauss_1d_np(FILTER_SIZE, s) for s in GAUSSIAN_SIGMAS]
    mh = [_conv_matrix_same_np(g, H) for g in g1ds]            # (H, H) each
    mwt = [_conv_matrix_same_np(g, W).T for g in g1ds]         # (W, W) each
    # Per channel: block-structured stage-1 operator so the kernel can run ONE
    # matmul over the sublane-stacked product planes of that channel:
    #   rows = (sigma, plane) blocks, cols = plane blocks,
    #   block (si, p), (p') = Mh[sigma_si] if p == p' else 0.
    mh_big = []
    for ch in range(CHANNEL):
        n_p = CH_NPLANES[ch]
        eye = np.eye(n_p, dtype=np.float32)
        blocks = [np.kron(eye, mh[s]) for s in CH_SIGMAS[ch]]  # (n_p*H, n_p*H)
        mh_big.append(np.concatenate(blocks, axis=0))          # (n_s*n_p*H, n_p*H)
    mwt_all = np.stack(mwt)                                    # (S, W, W)
    return tuple(mh_big), mwt_all


@functools.lru_cache(maxsize=None)
def _build_g_masks_np():
    # (15, 1, 33, 33) exactly as the PyTorch __init__ fills it (reference only).
    g1ds = [_gauss_1d_np(FILTER_SIZE, s) for s in GAUSSIAN_SIGMAS]
    masks = []
    for g in g1ds:
        m2d = np.outer(g, g)
        for _ in range(CHANNEL):
            masks.append(m2d)
    return np.stack(masks)[:, None, :, :].astype(np.float32)


# ------------------------------- Pallas kernel --------------------------------
def ms_ssim_l1_kernel(x_ref, y_ref, mh0_ref, mh1_ref, mh2_ref, mwt_ref, out_ref):
    H = x_ref.shape[2]
    W = x_ref.shape[3]
    mh_refs = (mh0_ref, mh1_ref, mh2_ref)

    pics = None      # running product over the 15 cs maps
    lM = None        # running product of l over the last 3 output channels
    gl1 = None       # Gaussian-weighted L1 map (already channel-meaned)
    d_sum = None     # running sum of |x_c - y_c| over channels

    for g in range(CHANNEL):
        xg = x_ref[0, g]                      # (H, W)
        yg = y_ref[0, g]
        d = jnp.abs(xg - yg)
        d_sum = d if d_sum is None else d_sum + d

        # Product planes for this channel, computed once and reused for every
        # sigma this channel needs.
        planes = [xg, yg, xg * xg, yg * yg, xg * yg]
        if g == CHANNEL - 1:
            # gaussian_l1 = mean_c conv(|x_c-y_c|, G4) = conv(mean_c |x_c-y_c|, G4)
            # (linearity + identical sigma-4 masks), folded into this group.
            planes.append(d_sum * (1.0 / CHANNEL))
        n_p = len(planes)
        sigmas = CH_SIGMAS[g]

        # Aligned sublane concat: (n_p*H, W); H is a multiple of 8.
        p_sub = jnp.concatenate(planes, axis=0)
        # Stage 1: ONE matmul for all (sigma, plane) pairs of this channel.
        r = jnp.dot(mh_refs[g][...], p_sub,
                    preferred_element_type=jnp.float32)        # (n_s*n_p*H, W)

        for si, s in enumerate(sigmas):
            r_s = r[si * n_p * H:(si + 1) * n_p * H, :]        # (n_p*H, W)
            # Stage 2: one matmul for all planes of this (channel, sigma).
            c_all = jnp.dot(r_s, mwt_ref[s],
                            preferred_element_type=jnp.float32)  # (n_p*H, W)

            mux = c_all[0 * H:1 * H]
            muy = c_all[1 * H:2 * H]
            ex2 = c_all[2 * H:3 * H]
            ey2 = c_all[3 * H:4 * H]
            exy = c_all[4 * H:5 * H]

            mux2 = mux * mux
            muy2 = muy * muy
            muxy = mux * muy
            sigmax2 = ex2 - mux2
            sigmay2 = ey2 - muy2
            sigmaxy = exy - muxy

            # EUP approximate reciprocal instead of a full divide.
            l = (2.0 * muxy + C1) * pl.reciprocal(mux2 + muy2 + C1, approx=True)
            cs = (2.0 * sigmaxy + C2) * pl.reciprocal(sigmax2 + sigmay2 + C2,
                                                      approx=True)

            # Running PIcs accumulator (multiplicity of this combo among the 15
            # grouped-conv output channels).
            term = cs
            for _ in range(COMBO_MULT[(g, s)] - 1):
                term = term * cs
            pics = term if pics is None else pics * term

            # Running lM accumulator (last 3 output channels).
            if (g, s) in LM_MULT:
                lterm = l
                for _ in range(LM_MULT[(g, s)] - 1):
                    lterm = lterm * l
                lM = lterm if lM is None else lM * lterm

            if g == CHANNEL - 1 and s == NUM_SIGMAS - 1:
                gl1 = c_all[5 * H:6 * H]

    loss_ms_ssim = 1.0 - lM * pics
    loss_mix = ALPHA * loss_ms_ssim + (1.0 - ALPHA) * gl1 * (1.0 / DATA_RANGE)
    loss_mix = COMPENSATION * loss_mix

    # Reduce to a per-image scalar inside the kernel: no (B,H,W) loss-map
    # writeback at all (wrapper only divides by B*H*W).
    row_sum = jnp.sum(loss_mix, axis=1, keepdims=True)   # (H, 1)  lane reduce
    total = jnp.sum(row_sum, axis=0, keepdims=True)      # (1, 1)  sublane reduce
    out_ref[...] = total[None]                           # (1, 1, 1)


# --------------------------------- wrapper ------------------------------------
@jax.jit
def ms_ssim_l1_loss(x, y):
    B, C, H, W = x.shape
    assert C == CHANNEL
    x = x.astype(jnp.float32)
    y = y.astype(jnp.float32)

    mh_big_np, mwt_np = _build_weights_np(H, W)           # cached per (H, W)
    mh_big0, mh_big1, mh_big2 = (jnp.asarray(m) for m in mh_big_np)
    mwt = jnp.asarray(mwt_np)

    in_specs = [
        pl.BlockSpec((1, C, H, W), lambda b: (b, 0, 0, 0)),
        pl.BlockSpec((1, C, H, W), lambda b: (b, 0, 0, 0)),
        # Constant block index -> weights stay resident in VMEM across the grid.
        pl.BlockSpec(mh_big0.shape, lambda b: (0, 0)),
        pl.BlockSpec(mh_big1.shape, lambda b: (0, 0)),
        pl.BlockSpec(mh_big2.shape, lambda b: (0, 0)),
        pl.BlockSpec((NUM_SIGMAS, W, W), lambda b: (0, 0, 0)),
    ]

    partial_sums = pl.pallas_call(
        ms_ssim_l1_kernel,
        out_shape=jax.ShapeDtypeStruct((B, 1, 1), jnp.float32),
        grid_spec=pltpu.PrefetchScalarGridSpec(
            num_scalar_prefetch=0,
            grid=(B,),
            in_specs=in_specs,
            out_specs=pl.BlockSpec((1, 1, 1), lambda b: (b, 0, 0)),
        ),
        compiler_params=pltpu.CompilerParams(
            dimension_semantics=("parallel",)),
    )(x, y, mh_big0, mh_big1, mh_big2, mwt)

    # Final scalar mean over (B, H, W) — trivial glue.
    return jnp.sum(partial_sums) / (B * H * W)


# ---------------------- pure-JAX reference (faithful to torch) ----------------
def reference_loss(x, y):
    w = jnp.asarray(_build_g_masks_np())

    def conv(inp, weight):
        return jax.lax.conv_general_dilated(
            inp, weight, window_strides=(1, 1),
            padding=[(PAD, PAD), (PAD, PAD)],
            dimension_numbers=("NCHW", "OIHW", "NCHW"),
            feature_group_count=CHANNEL)

    mux = conv(x, w)
    muy = conv(y, w)
    mux2, muy2, muxy = mux * mux, muy * muy, mux * muy
    sigmax2 = conv(x * x, w) - mux2
    sigmay2 = conv(y * y, w) - muy2
    sigmaxy = conv(x * y, w) - muxy
    l = (2 * muxy + C1) / (mux2 + muy2 + C1)
    cs = (2 * sigmaxy + C2) / (sigmax2 + sigmay2 + C2)
    lM = l[:, -1] * l[:, -2] * l[:, -3]
    PIcs = jnp.prod(cs, axis=1)
    loss_ms_ssim = 1.0 - lM * PIcs
    gl1 = conv(jnp.abs(x - y), w[-CHANNEL:]).mean(axis=1)
    loss_mix = ALPHA * loss_ms_ssim + (1.0 - ALPHA) * gl1 / DATA_RANGE
    return (COMPENSATION * loss_mix).mean()


if __name__ == "__main__":
    key = jax.random.PRNGKey(0)
    kx, ky = jax.random.split(key)
    shape = (2, CHANNEL, 16, 16)   # batch=2, channels=3 (module requires 3), 16x16
    x = jax.random.uniform(kx, shape, jnp.float32, 0.0, DATA_RANGE)
    y = jax.random.uniform(ky, shape, jnp.float32, 0.0, DATA_RANGE)

    loss = ms_ssim_l1_loss(x, y)
    jax.block_until_ready(loss)

    ref = reference_loss(x, y)
    np.testing.assert_allclose(np.asarray(loss), np.asarray(ref),
                               rtol=2e-3, atol=2e-3)
    print("KERNEL_OK")
</pallas_src>

<mosaic_0001>
module attributes {stable_mosaic.version = 11 : i64} {
  func.func @ms_ssim_l1_kernel(%arg0: i32, %arg1: memref<1x3x16x16xf32, #tpu.memory_space<vmem>>, %arg2: memref<1x3x16x16xf32, #tpu.memory_space<vmem>>, %arg3: memref<160x80xf32, #tpu.memory_space<vmem>>, %arg4: memref<240x80xf32, #tpu.memory_space<vmem>>, %arg5: memref<192x96xf32, #tpu.memory_space<vmem>>, %arg6: memref<5x16x16xf32, #tpu.memory_space<vmem>>, %arg7: memref<1x1x1xf32, #tpu.memory_space<vmem>>) attributes {dimension_semantics = [#tpu.dimension_semantics<parallel>], iteration_bounds = array<i64: 2>, scalar_prefetch = 0 : i64, scratch_operands = 0 : i64, tpu.core_type = #tpu.core_type<tc>, window_params = [{transform_indices = @transform_0, window_bounds = array<i64: 1, 3, 16, 16>}, {transform_indices = @transform_1, window_bounds = array<i64: 1, 3, 16, 16>}, {pipeline_mode = #tpu.pipeline_mode<synchronous>, transform_indices = @transform_2, window_bounds = array<i64: 160, 80>}, {pipeline_mode = #tpu.pipeline_mode<synchronous>, transform_indices = @transform_3, window_bounds = array<i64: 240, 80>}, {pipeline_mode = #tpu.pipeline_mode<synchronous>, transform_indices = @transform_4, window_bounds = array<i64: 192, 96>}, {pipeline_mode = #tpu.pipeline_mode<synchronous>, transform_indices = @transform_5, window_bounds = array<i64: 5, 16, 16>}, {transform_indices = @transform_6, window_bounds = array<i64: 1, 1, 1>}]} {
    %c0 = arith.constant 0 : index
    %c0_0 = arith.constant 0 : index
    %c0_1 = arith.constant 0 : index
    %c0_2 = arith.constant 0 : index
    %0 = vector.load %arg1[%c0, %c0_0, %c0_1, %c0_2] : memref<1x3x16x16xf32, #tpu.memory_space<vmem>>, vector<1x1x16x16xf32>
    %1 = vector.shape_cast %0 : vector<1x1x16x16xf32> to vector<16x16xf32>
    %c0_3 = arith.constant 0 : index
    %c0_4 = arith.constant 0 : index
    %c0_5 = arith.constant 0 : index
    %c0_6 = arith.constant 0 : index
    %2 = vector.load %arg2[%c0_3, %c0_4, %c0_5, %c0_6] : memref<1x3x16x16xf32, #tpu.memory_space<vmem>>, vector<1x1x16x16xf32>
    %3 = vector.shape_cast %2 : vector<1x1x16x16xf32> to vector<16x16xf32>
    %4 = arith.subf %1, %3 : vector<16x16xf32>
    %5 = math.absf %4 : vector<16x16xf32>
    %6 = arith.mulf %1, %1 : vector<16x16xf32>
    %7 = arith.mulf %3, %3 : vector<16x16xf32>
    %8 = arith.mulf %1, %3 : vector<16x16xf32>
    %9 = tpu.concatenate %1, %3, %6, %7, %8 in 0 : vector<16x16xf32>, vector<16x16xf32>, vector<16x16xf32>, vector<16x16xf32>, vector<16x16xf32> -> vector<80x16xf32>
    %c0_7 = arith.constant 0 : index
    %c0_8 = arith.constant 0 : index
    %10 = vector.load %arg3[%c0_7, %c0_8] : memref<160x80xf32, #tpu.memory_space<vmem>>, vector<160x80xf32>
    %cst = arith.constant dense<0.000000e+00> : vector<160x16xf32>
    %11 = tpu.matmul %10, %9, %cst {dimension_numbers = #tpu.dot_dimension_numbers<[1], [0], [0], [1], [0, 0, 1, 1], [], []>} : vector<160x80xf32>, vector<80x16xf32>, vector<160x16xf32> -> vector<160x16xf32>
    %12 = vector.extract_strided_slice %11 {offsets = [0, 0], sizes = [80, 16], strides = [1, 1]} : vector<160x16xf32> to vector<80x16xf32>
    %c0_9 = arith.constant 0 : index
    %c0_10 = arith.constant 0 : index
    %c0_11 = arith.constant 0 : index
    %13 = vector.load %arg6[%c0_9, %c0_10, %c0_11] : memref<5x16x16xf32, #tpu.memory_space<vmem>>, vector<1x16x16xf32>
    %14 = vector.shape_cast %13 : vector<1x16x16xf32> to vector<16x16xf32>
    %cst_12 = arith.constant dense<0.000000e+00> : vector<80x16xf32>
    %15 = tpu.matmul %12, %14, %cst_12 {dimension_numbers = #tpu.dot_dimension_numbers<[1], [0], [0], [1], [0, 0, 1, 1], [], []>} : vector<80x16xf32>, vector<16x16xf32>, vector<80x16xf32> -> vector<80x16xf32>
    %16 = vector.extract_strided_slice %15 {offsets = [0, 0], sizes = [16, 16], strides = [1, 1]} : vector<80x16xf32> to vector<16x16xf32>
    %17 = vector.extract_strided_slice %15 {offsets = [16, 0], sizes = [16, 16], strides = [1, 1]} : vector<80x16xf32> to vector<16x16xf32>
    %18 = vector.extract_strided_slice %15 {offsets = [32, 0], sizes = [16, 16], strides = [1, 1]} : vector<80x16xf32> to vector<16x16xf32>
    %19 = vector.extract_strided_slice %15 {offsets = [48, 0], sizes = [16, 16], strides = [1, 1]} : vector<80x16xf32> to vector<16x16xf32>
    %20 = vector.extract_strided_slice %15 {offsets = [64, 0], sizes = [16, 16], strides = [1, 1]} : vector<80x16xf32> to vector<16x16xf32>
    %21 = arith.mulf %16, %16 : vector<16x16xf32>
    %22 = arith.mulf %17, %17 : vector<16x16xf32>
    %23 = arith.mulf %16, %17 : vector<16x16xf32>
    %24 = arith.subf %18, %21 : vector<16x16xf32>
    %25 = arith.subf %19, %22 : vector<16x16xf32>
    %26 = arith.subf %20, %23 : vector<16x16xf32>
    %cst_13 = arith.constant 2.000000e+00 : f32
    %27 = vector.broadcast %cst_13 : f32 to vector<16x16xf32>
    %28 = arith.mulf %27, %26 : vector<16x16xf32>
    %cst_14 = arith.constant 5.852250e+01 : f32
    %29 = vector.broadcast %cst_14 : f32 to vector<16x16xf32>
    %30 = arith.addf %28, %29 : vector<16x16xf32>
    %31 = arith.addf %24, %25 : vector<16x16xf32>
    %cst_15 = arith.constant 5.852250e+01 : f32
    %32 = vector.broadcast %cst_15 : f32 to vector<16x16xf32>
    %33 = arith.addf %31, %32 : vector<16x16xf32>
    %34 = tpu.reciprocal %33 {approx = true} : vector<16x16xf32> -> vector<16x16xf32>
    %35 = arith.mulf %30, %34 : vector<16x16xf32>
    %36 = arith.mulf %35, %35 : vector<16x16xf32>
    %37 = arith.mulf %36, %35 : vector<16x16xf32>
    %38 = vector.extract_strided_slice %11 {offsets = [80, 0], sizes = [80, 16], strides = [1, 1]} : vector<160x16xf32> to vector<80x16xf32>
    %c1 = arith.constant 1 : index
    %c0_16 = arith.constant 0 : index
    %c0_17 = arith.constant 0 : index
    %39 = vector.load %arg6[%c1, %c0_16, %c0_17] : memref<5x16x16xf32, #tpu.memory_space<vmem>>, vector<1x16x16xf32>
    %40 = vector.shape_cast %39 : vector<1x16x16xf32> to vector<16x16xf32>
    %cst_18 = arith.constant dense<0.000000e+00> : vector<80x16xf32>
    %41 = tpu.matmul %38, %40, %cst_18 {dimension_numbers = #tpu.dot_dimension_numbers<[1], [0], [0], [1], [0, 0, 1, 1], [], []>} : vector<80x16xf32>, vector<16x16xf32>, vector<80x16xf32> -> vector<80x16xf32>
    %42 = vector.extract_strided_slice %41 {offsets = [0, 0], sizes = [16, 16], strides = [1, 1]} : vector<80x16xf32> to vector<16x16xf32>
    %43 = vector.extract_strided_slice %41 {offsets = [16, 0], sizes = [16, 16], strides = [1, 1]} : vector<80x16xf32> to vector<16x16xf32>
    %44 = vector.extract_strided_slice %41 {offsets = [32, 0], sizes = [16, 16], strides = [1, 1]} : vector<80x16xf32> to vector<16x16xf32>
    %45 = vector.extract_strided_slice %41 {offsets = [48, 0], sizes = [16, 16], strides = [1, 1]} : vector<80x16xf32> to vector<16x16xf32>
    %46 = vector.extract_strided_slice %41 {offsets = [64, 0], sizes = [16, 16], strides = [1, 1]} : vector<80x16xf32> to vector<16x16xf32>
    %47 = arith.mulf %42, %42 : vector<16x16xf32>
    %48 = arith.mulf %43, %43 : vector<16x16xf32>
    %49 = arith.mulf %42, %43 : vector<16x16xf32>
    %50 = arith.subf %44, %47 : vector<16x16xf32>
    %51 = arith.subf %45, %48 : vector<16x16xf32>
    %52 = arith.subf %46, %49 : vector<16x16xf32>
    %cst_19 = arith.constant 2.000000e+00 : f32
    %53 = vector.broadcast %cst_19 : f32 to vector<16x16xf32>
    %54 = arith.mulf %53, %52 : vector<16x16xf32>
    %cst_20 = arith.constant 5.852250e+01 : f32
    %55 = vector.broadcast %cst_20 : f32 to vector<16x16xf32>
    %56 = arith.addf %54, %55 : vector<16x16xf32>
    %57 = arith.addf %50, %51 : vector<16x16xf32>
    %cst_21 = arith.constant 5.852250e+01 : f32
    %58 = vector.broadcast %cst_21 : f32 to vector<16x16xf32>
    %59 = arith.addf %57, %58 : vector<16x16xf32>
    %60 = tpu.reciprocal %59 {approx = true} : vector<16x16xf32> -> vector<16x16xf32>
    %61 = arith.mulf %56, %60 : vector<16x16xf32>
    %62 = arith.mulf %61, %61 : vector<16x16xf32>
    %63 = arith.mulf %37, %62 : vector<16x16xf32>
    %c0_22 = arith.constant 0 : index
    %c1_23 = arith.constant 1 : index
    %c0_24 = arith.constant 0 : index
    %c0_25 = arith.constant 0 : index
    %64 = vector.load %arg1[%c0_22, %c1_23, %c0_24, %c0_25] : memref<1x3x16x16xf32, #tpu.memory_space<vmem>>, vector<1x1x16x16xf32>
    %65 = vector.shape_cast %64 : vector<1x1x16x16xf32> to vector<16x16xf32>
    %c0_26 = arith.constant 0 : index
    %c1_27 = arith.constant 1 : index
    %c0_28 = arith.constant 0 : index
    %c0_29 = arith.constant 0 : index
    %66 = vector.load %arg2[%c0_26, %c1_27, %c0_28, %c0_29] : memref<1x3x16x16xf32, #tpu.memory_space<vmem>>, vector<1x1x16x16xf32>
    %67 = vector.shape_cast %66 : vector<1x1x16x16xf32> to vector<16x16xf32>
    %68 = arith.subf %65, %67 : vector<16x16xf32>
    %69 = math.absf %68 : vector<16x16xf32>
    %70 = arith.addf %5, %69 : vector<16x16xf32>
    %71 = arith.mulf %65, %65 : vector<16x16xf32>
    %72 = arith.mulf %67, %67 : vector<16x16xf32>
    %73 = arith.mulf %65, %67 : vector<16x16xf32>
    %74 = tpu.concatenate %65, %67, %71, %72, %73 in 0 : vector<16x16xf32>, vector<16x16xf32>, vector<16x16xf32>, vector<16x16xf32>, vector<16x16xf32> -> vector<80x16xf32>
    %c0_30 = arith.constant 0 : index
    %c0_31 = arith.constant 0 : index
    %75 = vector.load %arg4[%c0_30, %c0_31] : memref<240x80xf32, #tpu.memory_space<vmem>>, vector<240x80xf32>
    %cst_32 = arith.constant dense<0.000000e+00> : vector<240x16xf32>
    %76 = tpu.matmul %75, %74, %cst_32 {dimension_numbers = #tpu.dot_dimension_numbers<[1], [0], [0], [1], [0, 0, 1, 1], [], []>} : vector<240x80xf32>, vector<80x16xf32>, vector<240x16xf32> -> vector<240x16xf32>
    %77 = vector.extract_strided_slice %76 {offsets = [0, 0], sizes = [80, 16], strides = [1, 1]} : vector<240x16xf32> to vector<80x16xf32>
    %c1_33 = arith.constant 1 : index
    %c0_34 = arith.constant 0 : index
    %c0_35 = arith.constant 0 : index
    %78 = vector.load %arg6[%c1_33, %c0_34, %c0_35] : memref<5x16x16xf32, #tpu.memory_space<vmem>>, vector<1x16x16xf32>
    %79 = vector.shape_cast %78 : vector<1x16x16xf32> to vector<16x16xf32>
    %cst_36 = arith.constant dense<0.000000e+00> : vector<80x16xf32>
    %80 = tpu.matmul %77, %79, %cst_36 {dimension_numbers = #tpu.dot_dimension_numbers<[1], [0], [0], [1], [0, 0, 1, 1], [], []>} : vector<80x16xf32>, vector<16x16xf32>, vector<80x16xf32> -> vector<80x16xf32>
    %81 = vector.extract_strided_slice %80 {offsets = [0, 0], sizes = [16, 16], strides = [1, 1]} : vector<80x16xf32> to vector<16x16xf32>
    %82 = vector.extract_strided_slice %80 {offsets = [16, 0], sizes = [16, 16], strides = [1, 1]} : vector<80x16xf32> to vector<16x16xf32>
    %83 = vector.extract_strided_slice %80 {offsets = [32, 0], sizes = [16, 16], strides = [1, 1]} : vector<80x16xf32> to vector<16x16xf32>
    %84 = vector.extract_strided_slice %80 {offsets = [48, 0], sizes = [16, 16], strides = [1, 1]} : vector<80x16xf32> to vector<16x16xf32>
    %85 = vector.extract_strided_slice %80 {offsets = [64, 0], sizes = [16, 16], strides = [1, 1]} : vector<80x16xf32> to vector<16x16xf32>
    %86 = arith.mulf %81, %81 : vector<16x16xf32>
    %87 = arith.mulf %82, %82 : vector<16x16xf32>
    %88 = arith.mulf %81, %82 : vector<16x16xf32>
    %89 = arith.subf %83, %86 : vector<16x16xf32>
    %90 = arith.subf %84, %87 : vector<16x16xf32>
    %91 = arith.subf %85, %88 : vector<16x16xf32>
    %cst_37 = arith.constant 2.000000e+00 : f32
    %92 = vector.broadcast %cst_37 : f32 to vector<16x16xf32>
    %93 = arith.mulf %92, %91 : vector<16x16xf32>
    %cst_38 = arith.constant 5.852250e+01 : f32
    %94 = vector.broadcast %cst_38 : f32 to vector<16x16xf32>
    %95 = arith.addf %93, %94 : vector<16x16xf32>
    %96 = arith.addf %89, %90 : vector<16x16xf32>
    %cst_39 = arith.constant 5.852250e+01 : f32
    %97 = vector.broadcast %cst_39 : f32 to vector<16x16xf32>
    %98 = arith.addf %96, %97 : vector<16x16xf32>
    %99 = tpu.reciprocal %98 {approx = true} : vector<16x16xf32> -> vector<16x16xf32>
    %100 = arith.mulf %95, %99 : vector<16x16xf32>
    %101 = arith.mulf %63, %100 : vector<16x16xf32>
    %102 = vector.extract_strided_slice %76 {offsets = [80, 0], sizes = [80, 16], strides = [1, 1]} : vector<240x16xf32> to vector<80x16xf32>
    %c2 = arith.constant 2 : index
    %c0_40 = arith.constant 0 : index
    %c0_41 = arith.constant 0 : index
    %103 = vector.load %arg6[%c2, %c0_40, %c0_41] : memref<5x16x16xf32, #tpu.memory_space<vmem>>, vector<1x16x16xf32>
    %104 = vector.shape_cast %103 : vector<1x16x16xf32> to vector<16x16xf32>
    %cst_42 = arith.constant dense<0.000000e+00> : vector<80x16xf32>
    %105 = tpu.matmul %102, %104, %cst_42 {dimension_numbers = #tpu.dot_dimension_numbers<[1], [0], [0], [1], [0, 0, 1, 1], [], []>} : vector<80x16xf32>, vector<16x16xf32>, vector<80x16xf32> -> vector<80x16xf32>
    %106 = vector.extract_strided_slice %105 {offsets = [0, 0], sizes = [16, 16], strides = [1, 1]} : vector<80x16xf32> to vector<16x16xf32>
    %107 = vector.extract_strided_slice %105 {offsets = [16, 0], sizes = [16, 16], strides = [1, 1]} : vector<80x16xf32> to vector<16x16xf32>
    %108 = vector.extract_strided_slice %105 {offsets = [32, 0], sizes = [16, 16], strides = [1, 1]} : vector<80x16xf32> to vector<16x16xf32>
    %109 = vector.extract_strided_slice %105 {offsets = [48, 0], sizes = [16, 16], strides = [1, 1]} : vector<80x16xf32> to vector<16x16xf32>
    %110 = vector.extract_strided_slice %105 {offsets = [64, 0], sizes = [16, 16], strides = [1, 1]} : vector<80x16xf32> to vector<16x16xf32>
    %111 = arith.mulf %106, %106 : vector<16x16xf32>
    %112 = arith.mulf %107, %107 : vector<16x16xf32>
    %113 = arith.mulf %106, %107 : vector<16x16xf32>
    %114 = arith.subf %108, %111 : vector<16x16xf32>
    %115 = arith.subf %109, %112 : vector<16x16xf32>
    %116 = arith.subf %110, %113 : vector<16x16xf32>
    %cst_43 = arith.constant 2.000000e+00 : f32
    %117 = vector.broadcast %cst_43 : f32 to vector<16x16xf32>
    %118 = arith.mulf %117, %116 : vector<16x16xf32>
    %cst_44 = arith.constant 5.852250e+01 : f32
    %119 = vector.broadcast %cst_44 : f32 to vector<16x16xf32>
    %120 = arith.addf %118, %119 : vector<16x16xf32>
    %121 = arith.addf %114, %115 : vector<16x16xf32>
    %cst_45 = arith.constant 5.852250e+01 : f32
    %122 = vector.broadcast %cst_45 : f32 to vector<16x16xf32>
    %123 = arith.addf %121, %122 : vector<16x16xf32>
    %124 = tpu.reciprocal %123 {approx = true} : vector<16x16xf32> -> vector<16x16xf32>
    %125 = arith.mulf %120, %124 : vector<16x16xf32>
    %126 = arith.mulf %125, %125 : vector<16x16xf32>
    %127 = arith.mulf %126, %125 : vector<16x16xf32>
    %128 = arith.mulf %101, %127 : vector<16x16xf32>
    %129 = vector.extract_strided_slice %76 {offsets = [160, 0], sizes = [80, 16], strides = [1, 1]} : vector<240x16xf32> to vector<80x16xf32>
    %c3 = arith.constant 3 : index
    %c0_46 = arith.constant 0 : index
    %c0_47 = arith.constant 0 : index
    %130 = vector.load %arg6[%c3, %c0_46, %c0_47] : memref<5x16x16xf32, #tpu.memory_space<vmem>>, vector<1x16x16xf32>
    %131 = vector.shape_cast %130 : vector<1x16x16xf32> to vector<16x16xf32>
    %cst_48 = arith.constant dense<0.000000e+00> : vector<80x16xf32>
    %132 = tpu.matmul %129, %131, %cst_48 {dimension_numbers = #tpu.dot_dimension_numbers<[1], [0], [0], [1], [0, 0, 1, 1], [], []>} : vector<80x16xf32>, vector<16x16xf32>, vector<80x16xf32> -> vector<80x16xf32>
    %133 = vector.extract_strided_slice %132 {offsets = [0, 0], sizes = [16, 16], strides = [1, 1]} : vector<80x16xf32> to vector<16x16xf32>
    %134 = vector.extract_strided_slice %132 {offsets = [16, 0], sizes = [16, 16], strides = [1, 1]} : vector<80x16xf32> to vector<16x16xf32>
    %135 = vector.extract_strided_slice %132 {offsets = [32, 0], sizes = [16, 16], strides = [1, 1]} : vector<80x16xf32> to vector<16x16xf32>
    %136 = vector.extract_strided_slice %132 {offsets = [48, 0], sizes = [16, 16], strides = [1, 1]} : vector<80x16xf32> to vector<16x16xf32>
    %137 = vector.extract_strided_slice %132 {offsets = [64, 0], sizes = [16, 16], strides = [1, 1]} : vector<80x16xf32> to vector<16x16xf32>
    %138 = arith.mulf %133, %133 : vector<16x16xf32>
    %139 = arith.mulf %134, %134 : vector<16x16xf32>
    %140 = arith.mulf %133, %134 : vector<16x16xf32>
    %141 = arith.subf %135, %138 : vector<16x16xf32>
    %142 = arith.subf %136, %139 : vector<16x16xf32>
    %143 = arith.subf %137, %140 : vector<16x16xf32>
    %cst_49 = arith.constant 2.000000e+00 : f32
    %144 = vector.broadcast %cst_49 : f32 to vector<16x16xf32>
    %145 = arith.mulf %144, %143 : vector<16x16xf32>
    %cst_50 = arith.constant 5.852250e+01 : f32
    %146 = vector.broadcast %cst_50 : f32 to vector<16x16xf32>
    %147 = arith.addf %145, %146 : vector<16x16xf32>
    %148 = arith.addf %141, %142 : vector<16x16xf32>
    %cst_51 = arith.constant 5.852250e+01 : f32
    %149 = vector.broadcast %cst_51 : f32 to vector<16x16xf32>
    %150 = arith.addf %148, %149 : vector<16x16xf32>
    %151 = tpu.reciprocal %150 {approx = true} : vector<16x16xf32> -> vector<16x16xf32>
    %152 = arith.mulf %147, %151 : vector<16x16xf32>
    %153 = arith.mulf %128, %152 : vector<16x16xf32>
    %c0_52 = arith.constant 0 : index
    %c2_53 = arith.constant 2 : index
    %c0_54 = arith.constant 0 : index
    %c0_55 = arith.constant 0 : index
    %154 = vector.load %arg1[%c0_52, %c2_53, %c0_54, %c0_55] : memref<1x3x16x16xf32, #tpu.memory_space<vmem>>, vector<1x1x16x16xf32>
    %155 = vector.shape_cast %154 : vector<1x1x16x16xf32> to vector<16x16xf32>
    %c0_56 = arith.constant 0 : index
    %c2_57 = arith.constant 2 : index
    %c0_58 = arith.constant 0 : index
    %c0_59 = arith.constant 0 : index
    %156 = vector.load %arg2[%c0_56, %c2_57, %c0_58, %c0_59] : memref<1x3x16x16xf32, #tpu.memory_space<vmem>>, vector<1x1x16x16xf32>
    %157 = vector.shape_cast %156 : vector<1x1x16x16xf32> to vector<16x16xf32>
    %158 = arith.subf %155, %157 : vector<16x16xf32>
    %159 = math.absf %158 : vector<16x16xf32>
    %160 = arith.addf %70, %159 : vector<16x16xf32>
    %161 = arith.mulf %155, %155 : vector<16x16xf32>
    %162 = arith.mulf %157, %157 : vector<16x16xf32>
    %163 = arith.mulf %155, %157 : vector<16x16xf32>
    %cst_60 = arith.constant 0.333333343 : f32
    %164 = vector.broadcast %cst_60 : f32 to vector<16x16xf32>
    %165 = arith.mulf %160, %164 : vector<16x16xf32>
    %166 = tpu.concatenate %155, %157, %161, %162, %163, %165 in 0 : vector<16x16xf32>, vector<16x16xf32>, vector<16x16xf32>, vector<16x16xf32>, vector<16x16xf32>, vector<16x16xf32> -> vector<96x16xf32>
    %c0_61 = arith.constant 0 : index
    %c0_62 = arith.constant 0 : index
    %167 = vector.load %arg5[%c0_61, %c0_62] : memref<192x96xf32, #tpu.memory_space<vmem>>, vector<192x96xf32>
    %cst_63 = arith.constant dense<0.000000e+00> : vector<192x16xf32>
    %168 = tpu.matmul %167, %166, %cst_63 {dimension_numbers = #tpu.dot_dimension_numbers<[1], [0], [0], [1], [0, 0, 1, 1], [], []>} : vector<192x96xf32>, vector<96x16xf32>, vector<192x16xf32> -> vector<192x16xf32>
    %169 = vector.extract_strided_slice %168 {offsets = [0, 0], sizes = [96, 16], strides = [1, 1]} : vector<192x16xf32> to vector<96x16xf32>
    %c3_64 = arith.constant 3 : index
    %c0_65 = arith.constant 0 : index
    %c0_66 = arith.constant 0 : index
    %170 = vector.load %arg6[%c3_64, %c0_65, %c0_66] : memref<5x16x16xf32, #tpu.memory_space<vmem>>, vector<1x16x16xf32>
    %171 = vector.shape_cast %170 : vector<1x16x16xf32> to vector<16x16xf32>
    %cst_67 = arith.constant dense<0.000000e+00> : vector<96x16xf32>
    %172 = tpu.matmul %169, %171, %cst_67 {dimension_numbers = #tpu.dot_dimension_numbers<[1], [0], [0], [1], [0, 0, 1, 1], [], []>} : vector<96x16xf32>, vector<16x16xf32>, vector<96x16xf32> -> vector<96x16xf32>
    %173 = vector.extract_strided_slice %172 {offsets = [0, 0], sizes = [16, 16], strides = [1, 1]} : vector<96x16xf32> to vector<16x16xf32>
    %174 = vector.extract_strided_slice %172 {offsets = [16, 0], sizes = [16, 16], strides = [1, 1]} : vector<96x16xf32> to vector<16x16xf32>
    %175 = vector.extract_strided_slice %172 {offsets = [32, 0], sizes = [16, 16], strides = [1, 1]} : vector<96x16xf32> to vector<16x16xf32>
    %176 = vector.extract_strided_slice %172 {offsets = [48, 0], sizes = [16, 16], strides = [1, 1]} : vector<96x16xf32> to vector<16x16xf32>
    %177 = vector.extract_strided_slice %172 {offsets = [64, 0], sizes = [16, 16], strides = [1, 1]} : vector<96x16xf32> to vector<16x16xf32>
    %178 = arith.mulf %173, %173 : vector<16x16xf32>
    %179 = arith.mulf %174, %174 : vector<16x16xf32>
    %180 = arith.mulf %173, %174 : vector<16x16xf32>
    %181 = arith.subf %175, %178 : vector<16x16xf32>
    %182 = arith.subf %176, %179 : vector<16x16xf32>
    %183 = arith.subf %177, %180 : vector<16x16xf32>
    %cst_68 = arith.constant 2.000000e+00 : f32
    %184 = vector.broadcast %cst_68 : f32 to vector<16x16xf32>
    %185 = arith.mulf %184, %183 : vector<16x16xf32>
    %cst_69 = arith.constant 5.852250e+01 : f32
    %186 = vector.broadcast %cst_69 : f32 to vector<16x16xf32>
    %187 = arith.addf %185, %186 : vector<16x16xf32>
    %188 = arith.addf %181, %182 : vector<16x16xf32>
    %cst_70 = arith.constant 5.852250e+01 : f32
    %189 = vector.broadcast %cst_70 : f32 to vector<16x16xf32>
    %190 = arith.addf %188, %189 : vector<16x16xf32>
    %191 = tpu.reciprocal %190 {approx = true} : vector<16x16xf32> -> vector<16x16xf32>
    %192 = arith.mulf %187, %191 : vector<16x16xf32>
    %193 = arith.mulf %192, %192 : vector<16x16xf32>
    %194 = arith.mulf %153, %193 : vector<16x16xf32>
    %195 = vector.extract_strided_slice %168 {offsets = [96, 0], sizes = [96, 16], strides = [1, 1]} : vector<192x16xf32> to vector<96x16xf32>
    %c4 = arith.constant 4 : index
    %c0_71 = arith.constant 0 : index
    %c0_72 = arith.constant 0 : index
    %196 = vector.load %arg6[%c4, %c0_71, %c0_72] : memref<5x16x16xf32, #tpu.memory_space<vmem>>, vector<1x16x16xf32>
    %197 = vector.shape_cast %196 : vector<1x16x16xf32> to vector<16x16xf32>
    %cst_73 = arith.constant dense<0.000000e+00> : vector<96x16xf32>
    %198 = tpu.matmul %195, %197, %cst_73 {dimension_numbers = #tpu.dot_dimension_numbers<[1], [0], [0], [1], [0, 0, 1, 1], [], []>} : vector<96x16xf32>, vector<16x16xf32>, vector<96x16xf32> -> vector<96x16xf32>
    %199 = vector.extract_strided_slice %198 {offsets = [0, 0], sizes = [16, 16], strides = [1, 1]} : vector<96x16xf32> to vector<16x16xf32>
    %200 = vector.extract_strided_slice %198 {offsets = [16, 0], sizes = [16, 16], strides = [1, 1]} : vector<96x16xf32> to vector<16x16xf32>
    %201 = vector.extract_strided_slice %198 {offsets = [32, 0], sizes = [16, 16], strides = [1, 1]} : vector<96x16xf32> to vector<16x16xf32>
    %202 = vector.extract_strided_slice %198 {offsets = [48, 0], sizes = [16, 16], strides = [1, 1]} : vector<96x16xf32> to vector<16x16xf32>
    %203 = vector.extract_strided_slice %198 {offsets = [64, 0], sizes = [16, 16], strides = [1, 1]} : vector<96x16xf32> to vector<16x16xf32>
    %204 = arith.mulf %199, %199 : vector<16x16xf32>
    %205 = arith.mulf %200, %200 : vector<16x16xf32>
    %206 = arith.mulf %199, %200 : vector<16x16xf32>
    %207 = arith.subf %201, %204 : vector<16x16xf32>
    %208 = arith.subf %202, %205 : vector<16x16xf32>
    %209 = arith.subf %203, %206 : vector<16x16xf32>
    %cst_74 = arith.constant 2.000000e+00 : f32
    %210 = vector.broadcast %cst_74 : f32 to vector<16x16xf32>
    %211 = arith.mulf %210, %206 : vector<16x16xf32>
    %cst_75 = arith.constant 6.502500e+00 : f32
    %212 = vector.broadcast %cst_75 : f32 to vector<16x16xf32>
    %213 = arith.addf %211, %212 : vector<16x16xf32>
    %214 = arith.addf %204, %205 : vector<16x16xf32>
    %cst_76 = arith.constant 6.502500e+00 : f32
    %215 = vector.broadcast %cst_76 : f32 to vector<16x16xf32>
    %216 = arith.addf %214, %215 : vector<16x16xf32>
    %217 = tpu.reciprocal %216 {approx = true} : vector<16x16xf32> -> vector<16x16xf32>
    %218 = arith.mulf %213, %217 : vector<16x16xf32>
    %cst_77 = arith.constant 2.000000e+00 : f32
    %219 = vector.broadcast %cst_77 : f32 to vector<16x16xf32>
    %220 = arith.mulf %219, %209 : vector<16x16xf32>
    %cst_78 = arith.constant 5.852250e+01 : f32
    %221 = vector.broadcast %cst_78 : f32 to vector<16x16xf32>
    %222 = arith.addf %220, %221 : vector<16x16xf32>
    %223 = arith.addf %207, %208 : vector<16x16xf32>
    %cst_79 = arith.constant 5.852250e+01 : f32
    %224 = vector.broadcast %cst_79 : f32 to vector<16x16xf32>
    %225 = arith.addf %223, %224 : vector<16x16xf32>
    %226 = tpu.reciprocal %225 {approx = true} : vector<16x16xf32> -> vector<16x16xf32>
    %227 = arith.mulf %222, %226 : vector<16x16xf32>
    %228 = arith.mulf %227, %227 : vector<16x16xf32>
    %229 = arith.mulf %228, %227 : vector<16x16xf32>
    %230 = arith.mulf %194, %229 : vector<16x16xf32>
    %231 = arith.mulf %218, %218 : vector<16x16xf32>
    %232 = arith.mulf %231, %218 : vector<16x16xf32>
    %233 = vector.extract_strided_slice %198 {offsets = [80, 0], sizes = [16, 16], strides = [1, 1]} : vector<96x16xf32> to vector<16x16xf32>
    %234 = arith.mulf %232, %230 : vector<16x16xf32>
    %cst_80 = arith.constant 1.000000e+00 : f32
    %235 = vector.broadcast %cst_80 : f32 to vector<16x16xf32>
    %236 = arith.subf %235, %234 : vector<16x16xf32>
    %cst_81 = arith.constant 0.839999973 : f32
    %237 = vector.broadcast %cst_81 : f32 to vector<16x16xf32>
    %238 = arith.mulf %237, %236 : vector<16x16xf32>
    %cst_82 = arith.constant 1.600000e-01 : f32
    %239 = vector.broadcast %cst_82 : f32 to vector<16x16xf32>
    %240 = arith.mulf %239, %233 : vector<16x16xf32>
    %cst_83 = arith.constant 0.00392156886 : f32
    %241 = vector.broadcast %cst_83 : f32 to vector<16x16xf32>
    %242 = arith.mulf %240, %241 : vector<16x16xf32>
    %243 = arith.addf %238, %242 : vector<16x16xf32>
    %cst_84 = arith.constant 2.000000e+02 : f32
    %244 = vector.broadcast %cst_84 : f32 to vector<16x16xf32>
    %245 = arith.mulf %244, %243 : vector<16x16xf32>
    %cst_85 = arith.constant dense<0.000000e+00> : vector<16xf32>
    %246 = vector.multi_reduction <add>, %245, %cst_85 [1] : vector<16x16xf32> to vector<16xf32>
    %247 = vector.shape_cast %246 : vector<16xf32> to vector<16x1xf32>
    %cst_86 = arith.constant dense<0.000000e+00> : vector<1xf32>
    %248 = vector.multi_reduction <add>, %247, %cst_86 [0] : vector<16x1xf32> to vector<1xf32>
    %249 = vector.shape_cast %248 : vector<1xf32> to vector<1x1xf32>
    %250 = vector.shape_cast %249 : vector<1x1xf32> to vector<1x1x1xf32>
    %c0_87 = arith.constant 0 : index
    %c0_88 = arith.constant 0 : index
    %c0_89 = arith.constant 0 : index
    %251 = vector.load %arg7[%c0_87, %c0_88, %c0_89] : memref<1x1x1xf32, #tpu.memory_space<vmem>>, vector<1x1x1xf32>
    tpu.vector_store %arg7[%c0_87, %c0_88, %c0_89], %250 {strides = array<i32>} : memref<1x1x1xf32, #tpu.memory_space<vmem>>, vector<1x1x1xf32>,
    return
  }
  func.func @transform_0(%arg0: i32) -> (i32, i32, i32, i32) {
    %c0_i32 = arith.constant 0 : i32
    %c0_i32_0 = arith.constant 0 : i32
    %c0_i32_1 = arith.constant 0 : i32
    %c0_i32_2 = arith.constant 0 : i32
    return %arg0, %c0_i32, %c0_i32_0, %c0_i32_1 : i32, i32, i32, i32
  }
  func.func @transform_1(%arg0: i32) -> (i32, i32, i32, i32) {
    %c0_i32 = arith.constant 0 : i32
    %c0_i32_0 = arith.constant 0 : i32
    %c0_i32_1 = arith.constant 0 : i32
    %c0_i32_2 = arith.constant 0 : i32
    return %arg0, %c0_i32, %c0_i32_0, %c0_i32_1 : i32, i32, i32, i32
  }
  func.func @transform_2(%arg0: i32) -> (i32, i32) {
    %c0_i32 = arith.constant 0 : i32
    %c0_i32_0 = arith.constant 0 : i32
    %c0_i32_1 = arith.constant 0 : i32
    return %c0_i32, %c0_i32_0 : i32, i32
  }
  func.func @transform_3(%arg0: i32) -> (i32, i32) {
    %c0_i32 = arith.constant 0 : i32
    %c0_i32_0 = arith.constant 0 : i32
    %c0_i32_1 = arith.constant 0 : i32
    return %c0_i32, %c0_i32_0 : i32, i32
  }
  func.func @transform_4(%arg0: i32) -> (i32, i32) {
    %c0_i32 = arith.constant 0 : i32
    %c0_i32_0 = arith.constant 0 : i32
    %c0_i32_1 = arith.constant 0 : i32
    return %c0_i32, %c0_i32_0 : i32, i32
  }
  func.func @transform_5(%arg0: i32) -> (i32, i32, i32) {
    %c0_i32 = arith.constant 0 : i32
    %c0_i32_0 = arith.constant 0 : i32
    %c0_i32_1 = arith.constant 0 : i32
    %c0_i32_2 = arith.constant 0 : i32
    return %c0_i32, %c0_i32_0, %c0_i32_1 : i32, i32, i32
  }
  func.func @transform_6(%arg0: i32) -> (i32, i32, i32) {
    %c0_i32 = arith.constant 0 : i32
    %c0_i32_0 = arith.constant 0 : i32
    %c0_i32_1 = arith.constant 0 : i32
    return %arg0, %c0_i32, %c0_i32_0 : i32, i32, i32
  }
}

</mosaic_0001>

<bundles_post_ra>
// kernel: ms_ssim_l1_loss.1
= control target key start
LH: loop header
LB: loop body
LE: loop exit
PB: predicated region body
PF: predicated region fallthrough
CT: control target
= control target key end

     0   :  { %11 = vsyncpa [#allocation3], 0  ;;  %s4313_s0 = inlined_call_operand.hbm [shape: f32[2,3,16,16], index: 0, kind: input, shape index: {}]   ;;  %s4314_s1 = inlined_call_operand.hbm [shape: f32[2,3,16,16], index: 1, kind: input, shape index: {}]   ;;  %s4315_s2 = inlined_call_operand.hbm [shape: f32[160,80], index: 2, kind: input, shape index: {}]   ;;  %s4316_s3 = inlined_call_operand.hbm [shape: f32[240,80], index: 3, kind: input, shape index: {}]   ;;  %s4317_s4 = inlined_call_operand.hbm [shape: f32[192,96], index: 4, kind: input, shape index: {}]   ;;  %s4318_s5 = inlined_call_operand.hbm [shape: f32[5,16,16], index: 5, kind: input, shape index: {}]   ;;  %s4319_s6 = inlined_call_operand.vmem [shape: f32[2,1,1], index: 6, kind: output, shape index: {}]  }
   0x1   :  { %13 = vsyncpa [#allocation3 + $0x1], 0 }
   0x2   :  { %14 = vsyncpa [#allocation5], 0 }
   0x3   :  { %16 = vsyncpa [#allocation5 + $0x1], 0 }
   0x4   :  { %17 = vsyncpa [#allocation8], 0 }
   0x5   :  { %18 = vsyncpa [#allocation11], 0  ;;  %s3765_s21 = smov 0   ;;  %s3767_s22 = smov 0  }
   0x6   :  { %s3769_s23 = smov 0   ;;  %s3771_s24 = smov 0  }
   0x7 LB: > { %s3784_s25 = sadd.s32 4294967295, %s3720_s24   ;;  %p44_p0 = scmp.ne.s32.totalorder %s3712_s22, %s3708_s21  ;;  %s3720_s24 = sphi %s3771_s24, %s4337_s24   ;;  %s3716_s23 = sphi %s3769_s23, %s4336_s23   ;;  %s3712_s22 = sphi %s3767_s22, %s4335_s22   ;;  %s3708_s21 = sphi %s3765_s21, %s4334_s21  }
   0x8   : > { %p4320_p1 = scmp.eq.s32.totalorder %s3784_s25, 0  ;;  %p2703_p2 = scmp.ge.s32.totalorder %s3720_s24, 1 }
   0x9   : > { %p191_p3 = scmp.lt.s32.totalorder %s3720_s24, 3  ;;  %s3722_s28 = smov [#allocation6]  }
   0xa   : > { %p3792_p4 = por %p4320_p1, %p44_p0  ;;  %s203_s29 = sshll.u32 %s3722_s28, 4  ;;  %s204_s29 = int_to_ptr.vmem [resolvable:$true] %s203_s29 }
   0xb   : > { %p3796_p5 = pnand %p2703_p2, %p191_p3  ;;  %s3723_s7 = smov [#allocation7]  }
   0xc   : > { %s4322_s26 = scalar_select %p3792_p4, 1, 0 }
   0xd   : > { %p3411_p6 = pneg %p3796_p5  ;;  %s216_s8 = sshll.u32 %s3723_s7, 4  ;;  %s217_s8 = int_to_ptr.vmem [resolvable:$true] %s216_s8 }
   0xe   : > { %s3724_s9 = smov [#allocation9]   ;;  %s3521_s11 = scalar_lea.vmem %s204_s29, 2560 }
   0xf   : > { %p3804_p7 = pnand %p3411_p6, %p4320_p1  ;;  %s229_s10 = sshll.u32 %s3724_s9, 4  ;;  %s230_s10 = int_to_ptr.vmem [resolvable:$true] %s229_s10 }
  0x10   : > { %p3522_p9 = scmp.ne.s32.totalorder %s204_s29, %s3521_s11  ;;  %p3529_p12 = scmp.lt.s32.totalorder %s204_s29, %s204_s29 }
  0x11   : > { %p3512_p8 = pneg %p3804_p7  ;;  %p3530_p13 = scmp.lt.s32.totalorder %s3521_s11, %s3521_s11 }
  0x13   : > { %p3524_p10 = pnand %p3522_p9, %p3512_p8  ;;  %p3531_p0 = por %p3530_p13, %p3529_p12 }
  0x15   : > { %p3525_p11 = pneg %p3524_p10 }
  0x17   : > { %p3532_p2 = pnand %p3531_p0, %p3525_p11 }
  0x19   : > { %3535 = shalt.err (!%p3532_p2)
}
  0x1a   : > { %s3725_s12 = smov 128   ;;  %s3726_s13 = smov 8  }
  0x1b   : > { %3414 = dma.hbm_to_vmem [thread:$0]  (!%p3804_p7), %s4315_s2, 2560, %s204_s29, [#allocation5], %s3725_s12, %s3725_s12, %s3726_s13  }
  0x1c   : > { %s3547_s16 = scalar_lea.vmem %s217_s8, 3840  ;;  %p3555_p10 = scmp.lt.s32.totalorder %s217_s8, %s217_s8 }
  0x1d   : > { %p3548_p3 = scmp.ne.s32.totalorder %s217_s8, %s3547_s16  ;;  %p3556_p11 = scmp.lt.s32.totalorder %s3547_s16, %s3547_s16 }
  0x1f   : > { %p3550_p6 = pnand %p3548_p3, %p3512_p8  ;;  %p3557_p12 = por %p3556_p11, %p3555_p10 }
  0x21   : > { %p3551_p9 = pneg %p3550_p6 }
  0x23   : > { %p3558_p13 = pnand %p3557_p12, %p3551_p9 }
  0x25   : > { %3561 = shalt.err (!%p3558_p13)
}
  0x26   : > { %3417 = dma.hbm_to_vmem [thread:$0]  (!%p3804_p7), %s4316_s3, 3840, %s217_s8, [#allocation8], %s3725_s12, %s3725_s12, %s3726_s13  }
  0x27   : > { %s3573_s19 = scalar_lea.vmem %s230_s10, 3072  ;;  %p3581_p6 = scmp.lt.s32.totalorder %s230_s10, %s230_s10 }
  0x28   : > { %p3574_p0 = scmp.ne.s32.totalorder %s230_s10, %s3573_s19  ;;  %p3582_p9 = scmp.lt.s32.totalorder %s3573_s19, %s3573_s19 }
  0x2a   : > { %p3576_p2 = pnand %p3574_p0, %p3512_p8  ;;  %p3583_p10 = por %p3582_p9, %p3581_p6 }
  0x2c   : > { %p3577_p3 = pneg %p3576_p2 }
  0x2e   : > { %p3584_p11 = pnand %p3583_p10, %p3577_p3 }
  0x30   : > { %3587 = shalt.err (!%p3584_p11)
}
  0x31   : > { %3420 = dma.hbm_to_vmem [thread:$0]  (!%p3804_p7), %s4317_s4, 3072, %s230_s10, [#allocation8], %s3725_s12, %s3725_s12, %s3726_s13  }
  0x32   : > { %s3727_s28 = smov [#allocation10]  }
  0x33   : > { %s242_s29 = sshll.u32 %s3727_s28, 4  ;;  %s243_s29 = int_to_ptr.vmem [resolvable:$true] %s242_s29 }
  0x34   : > { %s3599_s7 = scalar_lea.vmem %s243_s29, 1280  ;;  %p3607_p2 = scmp.lt.s32.totalorder %s243_s29, %s243_s29 }
  0x35   : > { %p3600_p12 = scmp.ne.s32.totalorder %s243_s29, %s3599_s7  ;;  %p3608_p3 = scmp.lt.s32.totalorder %s3599_s7, %s3599_s7 }
  0x37   : > { %p3602_p13 = pnand %p3600_p12, %p3512_p8  ;;  %p3609_p6 = por %p3608_p3, %p3607_p2 }
  0x39   : > { %p3603_p0 = pneg %p3602_p13 }
  0x3b   : > { %p3610_p9 = pnand %p3609_p6, %p3603_p0 }
  0x3d   : > { %3613 = shalt.err (!%p3610_p9)
}
  0x3e   : > { %3423 = dma.hbm_to_vmem [thread:$0]  (!%p3804_p7), %s4318_s5, 1280, %s243_s29, [#allocation11], %s3725_s12, %s3725_s12, %s3726_s13  }
  0x3f   : > { %s3855_s30 = sadd.s32 1, %s3720_s24   ;;  %s31_s10 = sadd.s32 1, %s3716_s23 }
  0x40   : > { %s28_s11 = ssub.s32 %s3720_s24, %s3855_s30  ;;  %p38_p8 = scmp.ne.s32.totalorder %s3716_s23, %s3712_s22 }
  0x41   : > { %p29_p10 = scmp.eq.s32.totalorder %s28_s11, 0  ;;  %p39_p11 = scmp.eq.s32.totalorder %s3720_s24, 0 }
  0x42   : > { %p3435_p12 = scmp.lt.s32.totalorder %s3720_s24, 2  ;;  %s256_s14 = sand.u32 1, %s3716_s23  }
  0x43   : > { %s3866_s15 = scalar_select %p29_p10, %s3716_s23, %s31_s10  }
  0x44   : > { %p40_p13 = por %p39_p11, %p38_p8  ;;  %s3868_s16 = smul.u32 48, %s256_s14 }
  0x45   : > { %s3387_s18 = smul.u32 768, %s3720_s24  ;;  %s3886_s8 = scalar_lea.sflag [#allocation3], %s256_s14 }
  0x46   : > { %p3872_p0 = pnand %p3435_p12, %p40_p13  ;;  %s260_s29 = scalar_lea.vmem [#allocation2], %s3868_s16 }
  0x47   : > { %s3881_s28 = scalar_lea.hbm %s4313_s0, %s3387_s18  ;;  %s267_s7 = sshll.u32 %s260_s29, 4  ;;  %s3884_s7 = int_to_ptr.vmem [resolvable:$true] %s267_s7 }
  0x48   : > { %s3614_s9 = scalar_lea.hbm %s3881_s28, 768  ;;  %p3616_p2 = pneg %p3872_p0 }
  0x49   : > { %p3615_p7 = scmp.ne.s32.totalorder %s3881_s28, %s3614_s9  ;;  %s3619_s20 = scalar_lea.hbm %s4313_s0, 1536 }
  0x4a   : > { %p3620_p9 = scmp.lt.s32.totalorder %s3881_s28, %s4313_s0  ;;  %p3621_p8 = scmp.lt.s32.totalorder %s3619_s20, %s3614_s9 }
  0x4b   : > { %p3617_p3 = pnand %p3616_p2, %p3615_p7 }
  0x4c   : > { %p3622_p10 = por %p3621_p8, %p3620_p9 }
  0x4d   : > { %p3618_p6 = pneg %p3617_p3 }
  0x4f   : > { %p3623_p11 = pnand %p3622_p10, %p3618_p6 }
  0x51   : > { %3626 = shalt.err (!%p3623_p11)
}
  0x52   : > { %s3627_s14 = scalar_lea.vmem %s3884_s7, 768  ;;  %s3728_s29 = smov [#allocation2]  }
  0x53   : > { %p3628_p12 = scmp.ne.s32.totalorder %s3884_s7, %s3627_s14  ;;  %s3632_s10 = sshll.u32 %s3728_s29, 4  ;;  %s3633_s10 = int_to_ptr.vmem [resolvable:$false] %s3632_s10 }
  0x54   : > { %s3634_s11 = scalar_lea.vmem %s3633_s10, 1536  ;;  %p3635_p3 = scmp.lt.s32.totalorder %s3884_s7, %s3633_s10 }
  0x55   : > { %p3630_p13 = pnand %p3628_p12, %p3616_p2  ;;  %p3636_p1 = scmp.lt.s32.totalorder %s3634_s11, %s3627_s14 }
  0x57   : > { %p3631_p7 = pneg %p3630_p13  ;;  %p3637_p4 = por %p3636_p1, %p3635_p3 }
  0x59   : > { %p3638_p9 = pnand %p3637_p4, %p3631_p7 }
  0x5b   : > { %3641 = shalt.err (!%p3638_p9)
}
  0x5c   : > { %3427 = dma.hbm_to_vmem [thread:$0]  (!%p3872_p0), %s3881_s28, 768, %s3884_s7, %s3886_s8, %s3725_s12, %s3725_s12, %s3726_s13  }
  0x5d   : > { %s3921_s20 = scalar_lea.hbm %s4314_s1, %s3387_s18  ;;  %s281_s21 = scalar_lea.vmem [#allocation4], %s3868_s16 }
  0x5e   : > { %s288_s14 = sshll.u32 %s281_s21, 4  ;;  %s4326_s29 = sand.u32 1, %s3720_s24   ;;  %s3924_s14 = int_to_ptr.vmem [resolvable:$true] %s288_s14 }
  0x5f   : > { %s278_s10 = scalar_lea.sflag [#allocation5], %s4326_s29  ;;  %s3642_s11 = scalar_lea.hbm %s3921_s20, 768 }
  0x60   : > { %p3643_p1 = scmp.ne.s32.totalorder %s3921_s20, %s3642_s11  ;;  %s3647_s18 = scalar_lea.hbm %s4314_s1, 1536 }
  0x61   : > { %p3648_p8 = scmp.lt.s32.totalorder %s3921_s20, %s4314_s1  ;;  %p3649_p10 = scmp.lt.s32.totalorder %s3647_s18, %s3642_s11 }
  0x62   : > { %p3645_p4 = pnand %p3643_p1, %p3616_p2 }
  0x63   : > { %p3650_p11 = por %p3649_p10, %p3648_p8 }
  0x64   : > { %p3646_p6 = pneg %p3645_p4 }
  0x66   : > { %p3651_p12 = pnand %p3650_p11, %p3646_p6 }
  0x68   : > { %3654 = shalt.err (!%p3651_p12)
}
  0x69   : > { %s3655_s24 = scalar_lea.vmem %s3924_s14, 768  ;;  %s3729_s16 = smov [#allocation4]  }
  0x6a   : > { %p3656_p13 = scmp.ne.s32.totalorder %s3924_s14, %s3655_s24  ;;  %s3660_s9 = sshll.u32 %s3729_s16, 4  ;;  %s3661_s9 = int_to_ptr.vmem [resolvable:$false] %s3660_s9 }
  0x6b   : > { %s3662_s21 = scalar_lea.vmem %s3661_s9, 1536  ;;  %p3663_p9 = scmp.lt.s32.totalorder %s3924_s14, %s3661_s9 }
  0x6c   : > { %p3658_p7 = pnand %p3656_p13, %p3616_p2  ;;  %p3664_p1 = scmp.lt.s32.totalorder %s3662_s21, %s3655_s24 }
  0x6e   : > { %p3659_p3 = pneg %p3658_p7  ;;  %p3665_p4 = por %p3664_p1, %p3663_p9 }
  0x70   : > { %p3666_p8 = pnand %p3665_p4, %p3659_p3 }
  0x72   : > { %3669 = shalt.err (!%p3666_p8)
}
  0x73   : > { %3430 = dma.hbm_to_vmem [thread:$0]  (!%p3872_p0), %s3921_s20, 768, %s3924_s14, %s278_s10, %s3725_s12, %s3725_s12, %s3726_s13  }
  0x74   : > { %300 = sbr.rel (%p3796_p5) target bundleno = 1078 (0x436), region = 44  ;;  %s302_s29 = sand.u32 (!%p3796_p5), 1, %s3712_s22  }
  0x75   : > { %s3390_s11 = smul.u32 (!%p3796_p5), 48, %s302_s29  ;;  %s303_s28 = scalar_lea.sflag (!%p3796_p5), [#allocation3], %s302_s29 }
  0x76   : > { %p4327_p2 = scmp.ne.s32.totalorder (!%p3796_p5), %s4322_s26, 0 }
  0x77   : > { %s3956_s7 = scalar_lea.vmem (!%p3796_p5), [#allocation2], %s3390_s11 }
  0x79   : > { %3687 = dma.done.wait (%p4327_p2), %s303_s28, 768  }
  0x7a   : > { %3689 = vsyncadd (%p4327_p2), %s303_s28, 4294966528  ;;  %s311_s19 = sand.u32 1, %s3784_s25   ;;  %s3963_s12 = scalar_lea.vmem [#allocation4], %s3390_s11 }
  0x7b   : > { %s312_s18 = scalar_lea.sflag [#allocation5], %s311_s19 }
  0x7c   : > { %3691 = dma.done.wait (%p4327_p2), %s312_s18, 768  }
  0x7d   : > { %3693 = vsyncadd (%p4327_p2), %s312_s18, 4294966528  ;;  %p4328_p5 = scmp.eq.s32.totalorder %s3784_s25, 0 }
  0x7f   : > { %3695 = dma.done.wait (%p4328_p5), [#allocation5], 2560   ;;  %p4329_p0 = pmov %p4328_p5 }
  0x81   : > { %3697 = vsyncadd (%p4329_p0), [#allocation5], 4294964736  ;;  %p4330_p6 = pmov %p4329_p0 }
  0x82   : > { %p4331_p10 = pmov %p4329_p0 }
  0x83   : > { %3699 = dma.done.wait (%p4330_p6), [#allocation8], 6912  }
  0x84   : > { %3701 = vsyncadd (%p4331_p10), [#allocation8], 4294960384  ;;  %p4332_p11 = pmov %p4329_p0 }
  0x85   : > { %p4333_p12 = pmov %p4329_p0 }
  0x86   : > { %3703 = dma.done.wait (%p4332_p11), [#allocation11], 1280  }
  0x87   : > { %3705 = vsyncadd (%p4333_p12), [#allocation11], 4294966016  ;;  %vm400_vm0 = vcmask 654336   ;;  %v3982_v0 = vld [vmem:[%s3956_s7 + $0x8] sm:$0xff]  ;;  %v3988_v2 = vld [vmem:[%s3956_s7] sm:$0xff]  ;;  %vm628_vm1 = vcmask 130048  }
  0x88   : > { %v3985_v1 = vld [vmem:[%s3963_s12 + $0x8] sm:$0xff]  ;;  %v3993_v4 = vld [vmem:[%s3963_s12] sm:$0xff]  ;;  %v375_v9 = vmul.f32 %v3982_v0, %v3982_v0  ;;  %v374_v11 = vmul.f32 %v3988_v2, %v3988_v2  ;;  %v4034_v35 = vld [vmem:[%s3956_s7 + $0x18] sm:$0xff]  ;;  %vm1898_vm2 = vcmask 785408   ;;  %p363_p13 = scmp.lt.s32.totalorder %s3784_s25, 1  ;;  %vm2580_vm3 = vcmask 0  }
  0x89   : > { %v379_v3 = vmul.f32 %v3985_v1, %v3982_v0  ;;  %v380_v5 = vld [vmem:[#allocation6] sm:$0xff]  ;;  %v378_v6 = vmul.f32 %v3993_v4, %v3988_v2  ;;  %v377_v7 = vmul.f32 %v3985_v1, %v3985_v1  ;;  %v376_v8 = vmul.f32 %v3993_v4, %v3993_v4  ;;  %v627_v10 = vld [vmem:[#allocation10 + $0x8] sm:$0xff]  ;;  %v381_v12 = vld [vmem:[#allocation6 + $0x8] sm:$0xff] }
  0x8a   : > { %3088 = vmatprep.mubr.msk.f32.mxu0 %vm400_vm0, %v380_v5  ;;  %3118 = vmatprep.subr.mxu1 %v627_v10  ;;  %v382_v13 = vld [vmem:[#allocation6 + $0x10] sm:$0xff]  ;;  %v383_v14 = vld [vmem:[#allocation6 + $0x18] sm:$0xff]  ;;  %v384_v15 = vld [vmem:[#allocation6 + $0x20] sm:$0xff]  ;;  %v371_v54 = vsub.f32 %v3982_v0, %v3985_v1  ;;  %v370_v60 = vsub.f32 %v3988_v2, %v3993_v4  ;;  %s4339_s25 = smov (!%p363_p13, %s3784_s25), 1 }
  0x8b   : > { %3068 = vmatprep.subr.mxu0 %v379_v3  ;;  %3119 = vmatpush3.msra.mxu1 %v627_v10  ;;  %v385_v16 = vld [vmem:[#allocation6 + $0x28] sm:$0xff]  ;;  %v386_v17 = vld [vmem:[#allocation6 + $0x30] sm:$0xff]  ;;  %v387_v18 = vld [vmem:[#allocation6 + $0x38] sm:$0xff]  ;;  %s365_s13 = scalar_lea.vmem %s4319_s6, %s4339_s25 }
  0x8c   : > { %3069 = vmatpush3.msra.mxu0 %v379_v3  ;;  %v388_v19 = vld [vmem:[#allocation6 + $0x40] sm:$0xff]  ;;  %v389_v20 = vld [vmem:[#allocation6 + $0x48] sm:$0xff]  ;;  %v390_v21 = vld [vmem:[#allocation6 + $0x50] sm:$0xff]  ;;  %v373_v3 = vand.u32 2147483647, %v371_v54 }
  0x8d   : > { %3070 = vmatprep.subr.mxu0 %v378_v6  ;;  %v391_v22 = vld [vmem:[#allocation6 + $0x58] sm:$0xff]  ;;  %v392_v23 = vld [vmem:[#allocation6 + $0x60] sm:$0xff]  ;;  %v393_v24 = vld [vmem:[#allocation6 + $0x68] sm:$0xff] }
  0x8e   : > { %3071 = vmatpush3.msra.mxu0 %v378_v6  ;;  %v394_v25 = vld [vmem:[#allocation6 + $0x70] sm:$0xff]  ;;  %v395_v26 = vld [vmem:[#allocation6 + $0x78] sm:$0xff]  ;;  %v396_v27 = vld [vmem:[#allocation6 + $0x80] sm:$0xff] }
  0x8f   : > { %3072 = vmatprep.subr.mxu0 %v377_v7  ;;  %v397_v28 = vld [vmem:[#allocation6 + $0x88] sm:$0xff]  ;;  %v398_v29 = vld [vmem:[#allocation6 + $0x90] sm:$0xff]  ;;  %v399_v30 = vld [vmem:[#allocation6 + $0x98] sm:$0xff] }
  0x90   : > { %3073 = vmatpush3.msra.mxu0 %v377_v7  ;;  %v626_v31 = vld [vmem:[#allocation10] sm:$0xff]  ;;  %v804_v32 = vld [vmem:[#allocation10 + $0x18] sm:$0xff]  ;;  %v803_v33 = vld [vmem:[#allocation10 + $0x10] sm:$0xff]  ;;  %v372_v7 = vand.u32 2147483647, %v370_v60 }
  0x91   : > { %3074 = vmatprep.subr.mxu0 %v376_v8  ;;  %3120 = vmatprep.subr.mxu1 %v626_v31  ;;  %v4037_v36 = vld [vmem:[%s3963_s12 + $0x18] sm:$0xff]  ;;  %v4051_v47 = vld [vmem:[%s3956_s7 + $0x10] sm:$0xff]  ;;  %v4065_v56 = vld [vmem:[%s3956_s7 + $0x28] sm:$0xff] }
  0x92   : > { %3075 = vmatpush3.msra.mxu0 %v376_v8  ;;  %3121 = vmatpush3.msra.mxu1 %v626_v31  ;;  %v995_v39 = vmul.f32 %v4037_v36, %v4034_v35  ;;  %v2758_v48 = vld [vmem:[%s3963_s12 + $0x10] sm:$0xff]  ;;  %v993_v53 = vmul.f32 %v4037_v36, %v4037_v36  ;;  %v985_v55 = vsub.f32 %v4034_v35, %v4037_v36  ;;  %v4068_v57 = vld [vmem:[%s3963_s12 + $0x28] sm:$0xff]  ;;  %v4075_v62 = vld [vmem:[%s3956_s7 + $0x20] sm:$0xff] }
  0x93   : > { %3076 = vmatprep.subr.mxu0 %v375_v9  ;;  %3137 = vmatprep.subr.mxu1 %v804_v32  ;;  %v994_v51 = vmul.f32 %v2758_v48, %v4051_v47  ;;  %v992_v59 = vmul.f32 %v2758_v48, %v2758_v48  ;;  %v984_v61 = vsub.f32 %v4051_v47, %v2758_v48  ;;  %v4078_v63 = vld [vmem:[%s3963_s12 + $0x20] sm:$0xff] }
  0x94   : > { %3077 = vmatpush3.msra.mxu0 %v375_v9  ;;  %v987_v5 = vand.u32 2147483647, %v985_v55  ;;  %v990_v6 = vmul.f32 %v4051_v47, %v4051_v47  ;;  %v1860_v9 = vsub.f32 %v4075_v62, %v4078_v63  ;;  %v1002_v31 = vld [vmem:[#allocation7 + $0x30] sm:$0xff]  ;;  %v1023_v55 = vld [vmem:[#allocation7 + $0xd8] sm:$0xff]  ;;  %v1876_v60 = vld [vmem:[#allocation9 + $0x10] sm:$0xff] }
  0x95   : > { %3078 = vmatprep.subr.mxu0 %v374_v11  ;;  %v986_v8 = vand.u32 2147483647, %v984_v61  ;;  %v1022_v54 = vld [vmem:[#allocation7 + $0xd0] sm:$0xff]  ;;  %v1877_v61 = vld [vmem:[#allocation9 + $0x18] sm:$0xff] }
  0x96   : > { %3079 = vmatpush3.msra.mxu0 %v374_v11  ;;  %v989_v11 = vadd.f32 %v987_v5, %v373_v3  ;;  %v1882_v3 = vld [vmem:[#allocation9 + $0x40] sm:$0xff]  ;;  %v1883_v5 = vld [vmem:[#allocation9 + $0x48] sm:$0xff] }
  0x97   : > { %3080 = vmatprep.subr.mxu0 %v3985_v1 }
  0x98   : > { %3081 = vmatpush3.msra.mxu0 %v3985_v1  ;;  %v991_v1 = vmul.f32 %v4034_v35, %v4034_v35 }
  0x99   : > { %3082 = vmatprep.subr.mxu0 %v3993_v4 }
  0x9a   : > { %3083 = vmatpush3.msra.mxu0 %v3993_v4 }
  0x9b   : > { %3084 = vmatprep.subr.mxu0 %v3982_v0 }
  0x9c   : > { %3085 = vmatpush3.msra.mxu0 %v3982_v0 }
  0x9d   : > { %3086 = vmatprep.subr.mxu0 %v3988_v2 }
  0x9e   : > { %3087 = vmatpush3.msra.mxu0 %v3988_v2  ;;  %v1861_v2 = vsub.f32 %v4065_v56, %v4068_v57 }
  0x9f   : > { %3089 = vmatmul.mubr.msk.f32.vlgmr.msra.gmra.mxu0 %vm400_vm0, %v381_v12  ;;  %3221 = vmatprep.subr.mxu0 %v804_v32 }
  0xa0   : > { %3091 = vmatprep.mubr.msk.f32.mxu0 %vm400_vm0, %v382_v13  ;;  %3222 = vmatpush3.msra.mxu0 %v804_v32  ;;  %v1863_v12 = vand.u32 2147483647, %v1861_v2  ;;  %v1884_v2 = vld [vmem:[#allocation9 + $0x50] sm:$0xff] }
  0xa1   : > { %3223 = vmatprep.subr.mxu0 %v803_v33 }
  0xa2   : > { %3224 = vmatpush3.msra.mxu0 %v803_v33 }
  0xa3   : > { %3092 = vmatmul.mubr.msk.f32.gmra.mxu0 %vm400_vm0, %v383_v14  ;;  %v988_v14 = vadd.f32 %v986_v8, %v372_v7  ;;  %v1887_v7 = vld [vmem:[#allocation9 + $0x68] sm:$0xff]  ;;  %v1888_v8 = vld [vmem:[#allocation9 + $0x70] sm:$0xff] }
  0xa4   : > { %3094 = vmatprep.mubr.msk.f32.mxu0 %vm400_vm0, %v384_v15  ;;  %v1862_v15 = vand.u32 2147483647, %v1860_v9  ;;  %v4164_v9 = vld [vmem:[#allocation10 + $0x28] sm:$0xff] }
  0xa5   : > { %3240 = vmatprep.subr.mxu0 %v4164_v9 }
  0xa7   : > { %3095 = vmatmul.mubr.msk.f32.gmra.mxu0 %vm400_vm0, %v385_v16 }
  0xa8   : > { %3097 = vmatprep.mubr.msk.f32.mxu0 %vm400_vm0, %v386_v17  ;;  %v1865_v17 = vadd.f32 %v1863_v12, %v989_v11  ;;  %v1890_v11 = vld [vmem:[#allocation9 + $0x80] sm:$0xff]  ;;  %v1891_v12 = vld [vmem:[#allocation9 + $0x88] sm:$0xff] }
  0xab   : > { %3098 = vmatmul.mubr.msk.f32.gmra.mxu0 %vm400_vm0, %v387_v18 }
  0xac   : > { %3100 = vmatprep.mubr.msk.f32.mxu0 %vm400_vm0, %v388_v19  ;;  %v996_v19 = vld [vmem:[#allocation7] sm:$0xff] }
  0xaf   : > { %3101 = vmatmul.mubr.msk.f32.gmra.mxu0 %vm400_vm0, %v389_v20  ;;  %v1864_v20 = vadd.f32 %v1862_v15, %v988_v14  ;;  %v1893_v14 = vld [vmem:[#allocation9 + $0x98] sm:$0xff]  ;;  %v1894_v15 = vld [vmem:[#allocation9 + $0xa0] sm:$0xff] }
  0xb0   : > { %3103 = vmatprep.mubr.msk.f32.mxu0 %vm400_vm0, %v390_v21  ;;  %v1873_v21 = vmul.f32 0.33333334, %v1865_v17  ;;  %v1895_v17 = vld [vmem:[#allocation9 + $0xa8] sm:$0xff] }
  0xb3   : > { %3104 = vmatmul.mubr.msk.f32.gmra.mxu0 %vm400_vm0, %v391_v22  ;;  %v997_v22 = vld [vmem:[#allocation7 + $0x8] sm:$0xff] }
  0xb4   : > { %3106 = vmatprep.mubr.msk.f32.mxu0 %vm400_vm0, %v392_v23  ;;  %v998_v23 = vld [vmem:[#allocation7 + $0x10] sm:$0xff] }
  0xb7   : > { %3107 = vmatmul.mubr.msk.f32.gmra.mxu0 %vm400_vm0, %v393_v24  ;;  %v1872_v24 = vmul.f32 0.33333334, %v1864_v20  ;;  %v4182_v20 = vld [vmem:[#allocation10 + $0x30] sm:$0xff] }
  0xb8   : > { %3109 = vmatprep.mubr.msk.f32.mxu0 %vm400_vm0, %v394_v25  ;;  %v1871_v25 = vmul.f32 %v4068_v57, %v4065_v56 }
  0xbb   : > { %3110 = vmatmul.mubr.msk.f32.gmra.mxu0 %vm400_vm0, %v395_v26  ;;  %v999_v26 = vld [vmem:[#allocation7 + $0x18] sm:$0xff] }
  0xbc   : > { %3112 = vmatprep.mubr.msk.f32.mxu0 %vm400_vm0, %v396_v27  ;;  %v1000_v27 = vld [vmem:[#allocation7 + $0x20] sm:$0xff] }
  0xbf   : > { %3113 = vmatmul.mubr.msk.f32.gmra.mxu0 %vm400_vm0, %v397_v28  ;;  %v1870_v28 = vmul.f32 %v4078_v63, %v4075_v62 }
  0xc0   : > { %3115 = vmatprep.mubr.msk.f32.mxu0 %vm400_vm0, %v398_v29  ;;  %v1869_v29 = vmul.f32 %v4068_v57, %v4068_v57 }
  0xc3   : > { %3116 = vmatmul.mubr.msk.f32.gmra.mxu0 %vm400_vm0, %v399_v30  ;;  %v1001_v30 = vld [vmem:[#allocation7 + $0x28] sm:$0xff] }
 0x15f   : > { %v3090_v34 = vpop.f32.mrf.mxu0 }
 0x161   : > { %v527_v37 = vpop.f32.mrf.mxu0 }
 0x162   : > { %3122 = vmatprep.mubr.msk.f32.mxu1 %vm628_vm1, %v527_v37  ;;  %v1005_v37 = vld [vmem:[#allocation7 + $0x48] sm:$0xff] }
 0x163   : > { %v3093_v38 = vpop.f32.mrf.mxu0  ;;  %3123 = vmatmul.mubr.msk.f32.vlgmr.msra.gmra.mxu1 %vm628_vm1, %v3090_v34  ;;  %v1003_v34 = vld [vmem:[#allocation7 + $0x38] sm:$0xff] }
 0x164   : > { %3138 = vmatpush3.msra.mxu1 %v804_v32  ;;  %v1868_v32 = vmul.f32 %v4078_v63, %v4078_v63 }
 0x165   : > { %v537_v40 = vpop.f32.mrf.mxu0  ;;  %3139 = vmatprep.subr.mxu1 %v803_v33 }
 0x166   : > { %3125 = vmatprep.mubr.msk.f32.mxu1 %vm628_vm1, %v537_v40  ;;  %3140 = vmatpush3.msra.mxu1 %v803_v33  ;;  %v1867_v33 = vmul.f32 %v4065_v56, %v4065_v56  ;;  %v1008_v40 = vld [vmem:[#allocation7 + $0x60] sm:$0xff] }
 0x167   : > { %v3096_v41 = vpop.f32.mrf.mxu0  ;;  %3126 = vmatmul.mubr.msk.f32.gmra.mxu1 %vm628_vm1, %v3093_v38  ;;  %3156 = vmatprep.subr.mxu1 %v995_v39  ;;  %v1006_v38 = vld [vmem:[#allocation7 + $0x50] sm:$0xff] }
 0x169   : > { %v547_v42 = vpop.f32.mrf.mxu0 }
 0x16a   : > { %3128 = vmatprep.mubr.msk.f32.mxu1 %vm628_vm1, %v547_v42  ;;  %v1010_v42 = vld [vmem:[#allocation7 + $0x70] sm:$0xff] }
 0x16b   : > { %v3099_v43 = vpop.f32.mrf.mxu0  ;;  %3129 = vmatmul.mubr.msk.f32.gmra.mxu1 %vm628_vm1, %v3096_v41  ;;  %v1009_v41 = vld [vmem:[#allocation7 + $0x68] sm:$0xff] }
 0x16d   : > { %v557_v44 = vpop.f32.mrf.mxu0 }
 0x16e   : > { %3131 = vmatprep.mubr.msk.f32.mxu1 %vm628_vm1, %v557_v44  ;;  %v1012_v44 = vld [vmem:[#allocation7 + $0x80] sm:$0xff] }
 0x16f   : > { %v3102_v45 = vpop.f32.mrf.mxu0  ;;  %3132 = vmatmul.mubr.msk.f32.gmra.mxu1 %vm628_vm1, %v3099_v43  ;;  %v1011_v43 = vld [vmem:[#allocation7 + $0x78] sm:$0xff] }
 0x171   : > { %v567_v46 = vpop.f32.mrf.mxu0 }
 0x172   : > { %3134 = vmatprep.mubr.msk.f32.mxu1 %vm628_vm1, %v567_v46  ;;  %v1014_v46 = vld [vmem:[#allocation7 + $0x90] sm:$0xff] }
 0x173   : > { %v3105_v49 = vpop.f32.mrf.mxu0  ;;  %3135 = vmatmul.mubr.msk.f32.gmra.mxu1 %vm628_vm1, %v3102_v45  ;;  %v1013_v45 = vld [vmem:[#allocation7 + $0x88] sm:$0xff] }
 0x175   : > { %v577_v50 = vpop.f32.mrf.mxu0 }
 0x176   : > { %3141 = vmatprep.mubr.msk.f32.mxu1 %vm628_vm1, %v577_v50  ;;  %v1018_v50 = vld [vmem:[#allocation7 + $0xb0] sm:$0xff] }
 0x177   : > { %v3108_v52 = vpop.f32.mrf.mxu0  ;;  %3142 = vmatmul.mubr.msk.f32.vlgmr.msra.gmra.mxu1 %vm628_vm1, %v3105_v49  ;;  %v1017_v49 = vld [vmem:[#allocation7 + $0xa8] sm:$0xff] }
 0x178   : > { %3157 = vmatpush3.msra.mxu1 %v995_v39  ;;  %v1007_v39 = vld [vmem:[#allocation7 + $0x58] sm:$0xff] }
 0x179   : > { %3158 = vmatprep.subr.mxu1 %v994_v51  ;;  %v587_v58 = vpop.f32.mrf.mxu0 }
 0x17a   : > { %3159 = vmatpush3.msra.mxu1 %v994_v51  ;;  %3144 = vmatprep.mubr.msk.f32.mxu1 %vm628_vm1, %v587_v58  ;;  %v1019_v51 = vld [vmem:[#allocation7 + $0xb8] sm:$0xff]  ;;  %v1874_v58 = vld [vmem:[#allocation9] sm:$0xff] }
 0x17b   : > { %3160 = vmatprep.subr.mxu1 %v993_v53  ;;  %v3111_v0 = vpop.f32.mrf.mxu0  ;;  %3145 = vmatmul.mubr.msk.f32.gmra.mxu1 %vm628_vm1, %v3108_v52  ;;  %v1020_v52 = vld [vmem:[#allocation7 + $0xc0] sm:$0xff] }
 0x17c   : > { %3161 = vmatpush3.msra.mxu1 %v993_v53  ;;  %v1021_v53 = vld [vmem:[#allocation7 + $0xc8] sm:$0xff] }
 0x17d   : > { %3162 = vmatprep.subr.mxu1 %v992_v59  ;;  %v597_v4 = vpop.f32.mrf.mxu0 }
 0x17e   : > { %3163 = vmatpush3.msra.mxu1 %v992_v59  ;;  %3147 = vmatprep.mubr.msk.f32.mxu1 %vm628_vm1, %v597_v4  ;;  %v1875_v59 = vld [vmem:[#allocation9 + $0x8] sm:$0xff]  ;;  %v1885_v4 = vld [vmem:[#allocation9 + $0x58] sm:$0xff] }
 0x17f   : > { %3164 = vmatprep.subr.mxu1 %v991_v1  ;;  %v3114_v10 = vpop.f32.mrf.mxu0  ;;  %3148 = vmatmul.mubr.msk.f32.gmra.mxu1 %vm628_vm1, %v3111_v0  ;;  %v1880_v0 = vld [vmem:[#allocation9 + $0x30] sm:$0xff] }
 0x180   : > { %3165 = vmatpush3.msra.mxu1 %v991_v1  ;;  %v1881_v1 = vld [vmem:[#allocation9 + $0x38] sm:$0xff] }
 0x181   : > { %3166 = vmatprep.subr.mxu1 %v990_v6  ;;  %v607_v13 = vpop.f32.mrf.mxu0 }
 0x182   : > { %3167 = vmatpush3.msra.mxu1 %v990_v6  ;;  %3150 = vmatprep.mubr.msk.f32.mxu1 %vm628_vm1, %v607_v13  ;;  %v1886_v6 = vld [vmem:[#allocation9 + $0x60] sm:$0xff]  ;;  %v1892_v13 = vld [vmem:[#allocation9 + $0x90] sm:$0xff] }
 0x183   : > { %3168 = vmatprep.subr.mxu1 %v4037_v36  ;;  %v3117_v16 = vpop.f32.mrf.mxu0  ;;  %3151 = vmatmul.mubr.msk.f32.gmra.mxu1 %vm628_vm1, %v3114_v10  ;;  %v1889_v10 = vld [vmem:[#allocation9 + $0x78] sm:$0xff] }
 0x184   : > { %3169 = vmatpush3.msra.mxu1 %v4037_v36  ;;  %v1866_v36 = vmul.f32 %v4075_v62, %v4075_v62 }
 0x185   : > { %3170 = vmatprep.subr.mxu1 %v2758_v48  ;;  %v617_v18 = vpop.f32.mrf.mxu0 }
 0x186   : > { %3171 = vmatpush3.msra.mxu1 %v2758_v48  ;;  %3153 = vmatprep.mubr.msk.f32.mxu1 %vm628_vm1, %v617_v18  ;;  %v1016_v48 = vld [vmem:[#allocation7 + $0xa0] sm:$0xff] }
 0x187   : > { %3172 = vmatprep.subr.mxu1 %v4034_v35  ;;  %3154 = vmatmul.mubr.msk.f32.gmra.mxu1 %vm628_vm1, %v3117_v16  ;;  %v4173_v16 = vld [vmem:[#allocation10 + $0x38] sm:$0xff]  ;;  %v1896_v18 = vld [vmem:[#allocation9 + $0xb0] sm:$0xff] }
 0x188   : > { %3173 = vmatpush3.msra.mxu1 %v4034_v35  ;;  %3176 = vmatprep.mubr.msk.f32.mxu1 %vm400_vm0, %v996_v19  ;;  %v1004_v35 = vld [vmem:[#allocation7 + $0x40] sm:$0xff]  ;;  %v1897_v19 = vld [vmem:[#allocation9 + $0xb8] sm:$0xff] }
 0x189   : > { %3174 = vmatprep.subr.mxu1 %v4051_v47 }
 0x18a   : > { %3175 = vmatpush3.msra.mxu1 %v4051_v47  ;;  %v1015_v47 = vld [vmem:[#allocation7 + $0x98] sm:$0xff] }
 0x18b   : > { %3278 = vmatprep.subr.mxu1 %v1873_v21  ;;  %3177 = vmatmul.mubr.msk.f32.vlgmr.msra.gmra.mxu1 %vm400_vm0, %v997_v22 }
 0x18c   : > { %3279 = vmatpush3.msra.mxu1 %v1873_v21  ;;  %3179 = vmatprep.mubr.msk.f32.mxu1 %vm400_vm0, %v998_v23 }
 0x18d   : > { %3280 = vmatprep.subr.mxu1 %v1872_v24 }
 0x18e   : > { %3281 = vmatpush3.msra.mxu1 %v1872_v24 }
 0x18f   : > { %3180 = vmatmul.mubr.msk.f32.gmra.mxu1 %vm400_vm0, %v999_v26  ;;  %3282 = vmatprep.subr.mxu1 %v1871_v25 }
 0x190   : > { %3182 = vmatprep.mubr.msk.f32.mxu1 %vm400_vm0, %v1000_v27  ;;  %3283 = vmatpush3.msra.mxu1 %v1871_v25 }
 0x191   : > { %3284 = vmatprep.subr.mxu1 %v1870_v28 }
 0x192   : > { %3285 = vmatpush3.msra.mxu1 %v1870_v28 }
 0x193   : > { %3183 = vmatmul.mubr.msk.f32.gmra.mxu1 %vm400_vm0, %v1001_v30  ;;  %3286 = vmatprep.subr.mxu1 %v1869_v29 }
 0x194   : > { %3185 = vmatprep.mubr.msk.f32.mxu1 %vm400_vm0, %v1002_v31  ;;  %3287 = vmatpush3.msra.mxu1 %v1869_v29 }
 0x195   : > { %3288 = vmatprep.subr.mxu1 %v1868_v32 }
 0x196   : > { %3289 = vmatpush3.msra.mxu1 %v1868_v32 }
 0x197   : > { %3186 = vmatmul.mubr.msk.f32.gmra.mxu1 %vm400_vm0, %v1003_v34  ;;  %3290 = vmatprep.subr.mxu1 %v1867_v33 }
 0x198   : > { %3188 = vmatprep.mubr.msk.f32.mxu1 %vm400_vm0, %v1004_v35  ;;  %3291 = vmatpush3.msra.mxu1 %v1867_v33 }
 0x199   : > { %3292 = vmatprep.subr.mxu1 %v1866_v36 }
 0x19a   : > { %3293 = vmatpush3.msra.mxu1 %v1866_v36 }
 0x19b   : > { %3189 = vmatmul.mubr.msk.f32.gmra.mxu1 %vm400_vm0, %v1005_v37  ;;  %3294 = vmatprep.subr.mxu1 %v4068_v57 }
 0x19c   : > { %3191 = vmatprep.mubr.msk.f32.mxu1 %vm400_vm0, %v1006_v38  ;;  %3295 = vmatpush3.msra.mxu1 %v4068_v57  ;;  %v1025_v57 = vld [vmem:[#allocation7 + $0xe8] sm:$0xff] }
 0x19d   : > { %3296 = vmatprep.subr.mxu1 %v4078_v63 }
 0x19e   : > { %3297 = vmatpush3.msra.mxu1 %v4078_v63  ;;  %v1879_v63 = vld [vmem:[#allocation9 + $0x28] sm:$0xff] }
 0x19f   : > { %3192 = vmatmul.mubr.msk.f32.gmra.mxu1 %vm400_vm0, %v1007_v39  ;;  %3298 = vmatprep.subr.mxu1 %v4065_v56 }
 0x1a0   : > { %3194 = vmatprep.mubr.msk.f32.mxu1 %vm400_vm0, %v1008_v40  ;;  %3299 = vmatpush3.msra.mxu1 %v4065_v56  ;;  %v1024_v56 = vld [vmem:[#allocation7 + $0xe0] sm:$0xff] }
 0x1a1   : > { %3300 = vmatprep.subr.mxu1 %v4075_v62 }
 0x1a2   : > { %3301 = vmatpush3.msra.mxu1 %v4075_v62  ;;  %v1878_v62 = vld [vmem:[#allocation9 + $0x20] sm:$0xff] }
 0x1a3   : > { %3195 = vmatmul.mubr.msk.f32.gmra.mxu1 %vm400_vm0, %v1009_v41  ;;  %3382 = vmatprep.subr.mxu1 %v4173_v16 }
 0x1a4   : > { %3197 = vmatprep.mubr.msk.f32.mxu1 %vm400_vm0, %v1010_v42 }
 0x1a7   : > { %3198 = vmatmul.mubr.msk.f32.gmra.mxu1 %vm400_vm0, %v1011_v43 }
 0x1a8   : > { %3200 = vmatprep.mubr.msk.f32.mxu1 %vm400_vm0, %v1012_v44 }
 0x1ab   : > { %3201 = vmatmul.mubr.msk.f32.gmra.mxu1 %vm400_vm0, %v1013_v45 }
 0x1ac   : > { %3203 = vmatprep.mubr.msk.f32.mxu1 %vm400_vm0, %v1014_v46 }
 0x1af   : > { %3204 = vmatmul.mubr.msk.f32.gmra.mxu1 %vm400_vm0, %v1015_v47 }
 0x1b0   : > { %3206 = vmatprep.mubr.msk.f32.mxu1 %vm400_vm0, %v1016_v48 }
 0x1b3   : > { %3207 = vmatmul.mubr.msk.f32.gmra.mxu1 %vm400_vm0, %v1017_v49 }
 0x1b4   : > { %3209 = vmatprep.mubr.msk.f32.mxu1 %vm400_vm0, %v1018_v50 }
 0x1b7   : > { %3210 = vmatmul.mubr.msk.f32.gmra.mxu1 %vm400_vm0, %v1019_v51 }
 0x1b8   : > { %3212 = vmatprep.mubr.msk.f32.mxu1 %vm400_vm0, %v1020_v52 }
 0x1bb   : > { %3213 = vmatmul.mubr.msk.f32.gmra.mxu1 %vm400_vm0, %v1021_v53 }
 0x1bc   : > { %3215 = vmatprep.mubr.msk.f32.mxu1 %vm400_vm0, %v1022_v54 }
 0x1bf   : > { %3216 = vmatmul.mubr.msk.f32.gmra.mxu1 %vm400_vm0, %v1023_v55 }
 0x1c0   : > { %3218 = vmatprep.mubr.msk.f32.mxu1 %vm400_vm0, %v1024_v56 }
 0x1c3   : > { %3219 = vmatmul.mubr.msk.f32.gmra.mxu1 %vm400_vm0, %v1025_v57 }
 0x1c4   : > { %3302 = vmatprep.mubr.msk.f32.mxu1 %vm1898_vm2, %v1874_v58 }
 0x1c7   : > { %3303 = vmatmul.mubr.msk.f32.vlgmr.msra.gmra.mxu1 %vm1898_vm2, %v1875_v59 }
 0x1c8   : > { %3305 = vmatprep.mubr.msk.f32.mxu1 %vm1898_vm2, %v1876_v60  ;;  %3384 = vmatpush3.msra.mxu1 %v4173_v16 }
 0x1c9   : > { %3383 = vmatprep.subr.mxu1 %v4182_v20 }
 0x1ca   : > { %3385 = vmatpush3.msra.mxu1 %v4182_v20 }
 0x1cb   : > { %3306 = vmatmul.mubr.msk.f32.gmra.mxu1 %vm1898_vm2, %v1877_v61 }
 0x1cc   : > { %3308 = vmatprep.mubr.msk.f32.mxu1 %vm1898_vm2, %v1878_v62 }
 0x1cf   : > { %3309 = vmatmul.mubr.msk.f32.gmra.mxu1 %vm1898_vm2, %v1879_v63 }
 0x1d0   : > { %3311 = vmatprep.mubr.msk.f32.mxu1 %vm1898_vm2, %v1880_v0 }
 0x1d3   : > { %3312 = vmatmul.mubr.msk.f32.gmra.mxu1 %vm1898_vm2, %v1881_v1 }
 0x1d4   : > { %3314 = vmatprep.mubr.msk.f32.mxu1 %vm1898_vm2, %v1882_v3 }
 0x1d7   : > { %3315 = vmatmul.mubr.msk.f32.gmra.mxu1 %vm1898_vm2, %v1883_v5 }
 0x1d8   : > { %3317 = vmatprep.mubr.msk.f32.mxu1 %vm1898_vm2, %v1884_v2 }
 0x1db   : > { %3318 = vmatmul.mubr.msk.f32.gmra.mxu1 %vm1898_vm2, %v1885_v4 }
 0x1dc   : > { %3320 = vmatprep.mubr.msk.f32.mxu1 %vm1898_vm2, %v1886_v6 }
 0x1df   : > { %3321 = vmatmul.mubr.msk.f32.gmra.mxu1 %vm1898_vm2, %v1887_v7 }
 0x1e0   : > { %3323 = vmatprep.mubr.msk.f32.mxu1 %vm1898_vm2, %v1888_v8 }
 0x1e3   : > { %3324 = vmatmul.mubr.msk.f32.gmra.mxu1 %vm1898_vm2, %v1889_v10 }
 0x1e4   : > { %3326 = vmatprep.mubr.msk.f32.mxu1 %vm1898_vm2, %v1890_v11 }
 0x1e7   : > { %3327 = vmatmul.mubr.msk.f32.gmra.mxu1 %vm1898_vm2, %v1891_v12 }
 0x1e8   : > { %3329 = vmatprep.mubr.msk.f32.mxu1 %vm1898_vm2, %v1892_v13 }
 0x1eb   : > { %3330 = vmatmul.mubr.msk.f32.gmra.mxu1 %vm1898_vm2, %v1893_v14 }
 0x1ec   : > { %3332 = vmatprep.mubr.msk.f32.mxu1 %vm1898_vm2, %v1894_v15 }
 0x1ef   : > { %3333 = vmatmul.mubr.msk.f32.gmra.mxu1 %vm1898_vm2, %v1895_v17 }
 0x1f0   : > { %3335 = vmatprep.mubr.msk.f32.mxu1 %vm1898_vm2, %v1896_v18 }
 0x1f3   : > { %3336 = vmatmul.mubr.msk.f32.gmra.mxu1 %vm1898_vm2, %v1897_v19 }
 0x223   : > { %v3124_v21 = vpop.f32.mrf.mxu1 }
 0x224   : > { %v775_v26 = vmul.f32 %v3124_v21, %v3124_v21 }
 0x225   : > { %v725_v22 = vpop.f32.mrf.mxu1 }
 0x226   : > { %v774_v29 = vmul.f32 %v725_v22, %v725_v22 }
 0x227   : > { %v3127_v23 = vpop.f32.mrf.mxu1 }
 0x228   : > { %v779_v24 = vmul.f32 %v3127_v23, %v3124_v21  ;;  %v777_v32 = vmul.f32 %v3127_v23, %v3127_v23 }
 0x229   : > { %v735_v25 = vpop.f32.mrf.mxu1 }
 0x22a   : > { %v778_v27 = vmul.f32 %v735_v25, %v725_v22  ;;  %v776_v35 = vmul.f32 %v735_v25, %v735_v25  ;;  %v1503_v22 = vld [vmem:[#allocation10 + $0x20] sm:$0xff] }
 0x22b   : > { %v3130_v28 = vpop.f32.mrf.mxu1 }
 0x22c   : > { %v781_v30 = vsub.f32 %v3130_v28, %v775_v26 }
 0x22d   : > { %v745_v31 = vpop.f32.mrf.mxu1 }
 0x22e   : > { %v780_v33 = vsub.f32 %v745_v31, %v774_v29 }
 0x22f   : > { %v3133_v34 = vpop.f32.mrf.mxu1 }
 0x230   : > { %v783_v36 = vsub.f32 %v3133_v34, %v777_v32 }
 0x231   : > { %v755_v37 = vpop.f32.mrf.mxu1 }
 0x232   : > { %v791_v38 = vadd.f32 %v783_v36, %v781_v30  ;;  %v782_v39 = vsub.f32 %v755_v37, %v776_v35 }
 0x233   : > { %v3136_v40 = vpop.f32.mrf.mxu1 }
 0x234   : > { %v793_v41 = vadd.f32 58.5225, %v791_v38  ;;  %v790_v42 = vadd.f32 %v782_v39, %v780_v33  ;;  %v785_v43 = vsub.f32 %v3136_v40, %v779_v24 }
 0x235   : > { %v765_v44 = vpop.f32.mrf.mxu1 }
 0x236   : > { %3478 = vrcp.f32 %v793_v41  ;;  %v792_v45 = vadd.f32 58.5225, %v790_v42  ;;  %v784_v46 = vsub.f32 %v765_v44, %v778_v27  ;;  %v787_v52 = vmul.f32 2.0, %v785_v43 }
 0x237   : > { %v3143_v47 = vpop.f32.mrf.mxu1 }
 0x238   : > { %3480 = vrcp.f32 %v792_v45  ;;  %v951_v53 = vmul.f32 %v3143_v47, %v3143_v47  ;;  %v786_v56 = vmul.f32 2.0, %v784_v46  ;;  %v789_v60 = vadd.f32 58.5225, %v787_v52 }
 0x239   : > { %v901_v48 = vpop.f32.mrf.mxu1 }
 0x23a   : > { %v950_v57 = vmul.f32 %v901_v48, %v901_v48  ;;  %v788_v3 = vadd.f32 58.5225, %v786_v56 }
 0x23b   : > { %v3146_v49 = vpop.f32.mrf.mxu1 }
 0x23c   : > { %v955_v50 = vmul.f32 %v3146_v49, %v3143_v47  ;;  %v953_v61 = vmul.f32 %v3146_v49, %v3146_v49 }
 0x23d   : > { %v911_v51 = vpop.f32.mrf.mxu1 }
 0x23e   : > { %v954_v54 = vmul.f32 %v911_v51, %v901_v48  ;;  %v952_v5 = vmul.f32 %v911_v51, %v911_v51 }
 0x23f   : > { %v3149_v55 = vpop.f32.mrf.mxu1 }
 0x240   : > { %v957_v58 = vsub.f32 %v3149_v55, %v951_v53 }
 0x241   : > { %v921_v59 = vpop.f32.mrf.mxu1 }
 0x242   : > { %v956_v62 = vsub.f32 %v921_v59, %v950_v57  ;;  %v2345_v59 = vld [vmem:[#allocation10 + $0x48] sm:$0xff] }
 0x243   : > { %v3479_v63 = vpop.eup %3478  ;;  %v3152_v0 = vpop.f32.mrf.mxu1 }
 0x244   : > { %v797_v1 = vmul.f32 %v3479_v63, %v789_v60  ;;  %v959_v2 = vsub.f32 %v3152_v0, %v953_v61 }
 0x245   : > { %v3481_v4 = vpop.eup %3480  ;;  %v931_v6 = vpop.f32.mrf.mxu1 }
 0x246   : > { %v796_v7 = vmul.f32 %v3481_v4, %v788_v3  ;;  %v967_v8 = vadd.f32 %v959_v2, %v957_v58  ;;  %v958_v10 = vsub.f32 %v931_v6, %v952_v5  ;;  %v799_v29 = vmul.f32 %v797_v1, %v797_v1  ;;  %v2344_v5 = vld [vmem:[#allocation10 + $0x40] sm:$0xff] }
 0x247   : > { %v3155_v11 = vpop.f32.mrf.mxu1 }
 0x248   : > { %v969_v12 = vadd.f32 58.5225, %v967_v8  ;;  %v966_v13 = vadd.f32 %v958_v10, %v956_v62  ;;  %v961_v14 = vsub.f32 %v3155_v11, %v955_v50  ;;  %v801_v37 = vmul.f32 %v799_v29, %v797_v1 }
 0x249   : > { %v941_v15 = vpop.f32.mrf.mxu1 }
 0x24a   : > { %3482 = vrcp.f32 %v969_v12  ;;  %v968_v17 = vadd.f32 58.5225, %v966_v13  ;;  %v960_v18 = vsub.f32 %v941_v15, %v954_v54  ;;  %v963_v25 = vmul.f32 2.0, %v961_v14 }
 0x24b   : > { %v3178_v19 = vpop.f32.mrf.mxu1 }
 0x24c   : > { %3484 = vrcp.f32 %v968_v17  ;;  %v962_v27 = vmul.f32 2.0, %v960_v18  ;;  %v965_v30 = vadd.f32 58.5225, %v963_v25 }
 0x24d   : > { %v1182_v21 = vpop.f32.mrf.mxu1 }
 0x24e   : > { %3225 = vmatprep.mubr.msk.f32.mxu0 %vm628_vm1, %v1182_v21  ;;  %v964_v34 = vadd.f32 58.5225, %v962_v27 }
 0x24f   : > { %v3181_v23 = vpop.f32.mrf.mxu1  ;;  %3226 = vmatmul.mubr.msk.f32.vlgmr.msra.gmra.mxu0 %vm628_vm1, %v3178_v19 }
 0x250   : > { %3241 = vmatpush3.msra.mxu0 %v4164_v9  ;;  %v798_v9 = vmul.f32 %v796_v7, %v796_v7 }
 0x251   : > { %v1192_v24 = vpop.f32.mrf.mxu1  ;;  %3242 = vmatprep.subr.mxu0 %v1503_v22 }
 0x252   : > { %3228 = vmatprep.mubr.msk.f32.mxu0 %vm628_vm1, %v1192_v24  ;;  %3243 = vmatpush3.msra.mxu0 %v1503_v22  ;;  %v800_v41 = vmul.f32 %v798_v9, %v796_v7 }
 0x253   : > { %v3184_v26 = vpop.f32.mrf.mxu1  ;;  %3229 = vmatmul.mubr.msk.f32.gmra.mxu0 %vm628_vm1, %v3181_v23  ;;  %3259 = vmatprep.subr.mxu0 %v4173_v16 }
 0x255   : > { %v1202_v28 = vpop.f32.mrf.mxu1 }
 0x256   : > { %3231 = vmatprep.mubr.msk.f32.mxu0 %vm628_vm1, %v1202_v28 }
 0x257   : > { %v3483_v31 = vpop.eup %3482  ;;  %v3187_v32 = vpop.f32.mrf.mxu1  ;;  %3232 = vmatmul.mubr.msk.f32.gmra.mxu0 %vm628_vm1, %v3184_v26 }
 0x258   : > { %v973_v33 = vmul.f32 %v3483_v31, %v965_v30 }
 0x259   : > { %v3485_v35 = vpop.eup %3484  ;;  %v1212_v36 = vpop.f32.mrf.mxu1 }
 0x25a   : > { %v975_v38 = vmul.f32 %v973_v33, %v973_v33  ;;  %v972_v39 = vmul.f32 %v3485_v35, %v964_v34  ;;  %3234 = vmatprep.mubr.msk.f32.mxu0 %vm628_vm1, %v1212_v36 }
 0x25b   : > { %v3190_v40 = vpop.f32.mrf.mxu1  ;;  %3235 = vmatmul.mubr.msk.f32.gmra.mxu0 %vm628_vm1, %v3187_v32 }
 0x25c   : > { %v4196_v42 = vmul.f32 %v975_v38, %v801_v37  ;;  %v974_v43 = vmul.f32 %v972_v39, %v972_v39 }
 0x25d   : > { %v1222_v44 = vpop.f32.mrf.mxu1 }
 0x25e   : > { %v4198_v45 = vmul.f32 %v974_v43, %v800_v41  ;;  %3237 = vmatprep.mubr.msk.f32.mxu0 %vm628_vm1, %v1222_v44 }
 0x25f   : > { %v3193_v46 = vpop.f32.mrf.mxu1  ;;  %3238 = vmatmul.mubr.msk.f32.gmra.mxu0 %vm628_vm1, %v3190_v40 }
 0x261   : > { %v1232_v47 = vpop.f32.mrf.mxu1 }
 0x262   : > { %3244 = vmatprep.mubr.msk.f32.mxu0 %vm628_vm1, %v1232_v47 }
 0x263   : > { %v3196_v48 = vpop.f32.mrf.mxu1  ;;  %3245 = vmatmul.mubr.msk.f32.vlgmr.msra.gmra.mxu0 %vm628_vm1, %v3193_v46 }
 0x264   : > { %3260 = vmatpush3.msra.mxu0 %v4173_v16 }
 0x265   : > { %v1242_v49 = vpop.f32.mrf.mxu1  ;;  %3261 = vmatprep.subr.mxu0 %v4182_v20 }
 0x266   : > { %3247 = vmatprep.mubr.msk.f32.mxu0 %vm628_vm1, %v1242_v49  ;;  %3262 = vmatpush3.msra.mxu0 %v4182_v20 }
 0x267   : > { %v3199_v50 = vpop.f32.mrf.mxu1  ;;  %3248 = vmatmul.mubr.msk.f32.gmra.mxu0 %vm628_vm1, %v3196_v48  ;;  %3338 = vmatprep.subr.mxu0 %v4173_v16 }
 0x269   : > { %v1252_v51 = vpop.f32.mrf.mxu1 }
 0x26a   : > { %3250 = vmatprep.mubr.msk.f32.mxu0 %vm628_vm1, %v1252_v51 }
 0x26b   : > { %v3202_v52 = vpop.f32.mrf.mxu1  ;;  %3251 = vmatmul.mubr.msk.f32.gmra.mxu0 %vm628_vm1, %v3199_v50 }
 0x26d   : > { %v1262_v53 = vpop.f32.mrf.mxu1 }
 0x26e   : > { %3253 = vmatprep.mubr.msk.f32.mxu0 %vm628_vm1, %v1262_v53 }
 0x26f   : > { %v3205_v54 = vpop.f32.mrf.mxu1  ;;  %3254 = vmatmul.mubr.msk.f32.gmra.mxu0 %vm628_vm1, %v3202_v52 }
 0x271   : > { %v1272_v55 = vpop.f32.mrf.mxu1 }
 0x272   : > { %3256 = vmatprep.mubr.msk.f32.mxu0 %vm628_vm1, %v1272_v55 }
 0x273   : > { %v3208_v56 = vpop.f32.mrf.mxu1  ;;  %3257 = vmatmul.mubr.msk.f32.gmra.mxu0 %vm628_vm1, %v3205_v54 }
 0x275   : > { %v1282_v57 = vpop.f32.mrf.mxu1 }
 0x276   : > { %3263 = vmatprep.mubr.msk.f32.mxu0 %vm628_vm1, %v1282_v57 }
 0x277   : > { %v3211_v58 = vpop.f32.mrf.mxu1  ;;  %3264 = vmatmul.mubr.msk.f32.vlgmr.msra.gmra.mxu0 %vm628_vm1, %v3208_v56 }
 0x278   : > { %3339 = vmatpush3.msra.mxu0 %v4173_v16 }
 0x279   : > { %v1292_v60 = vpop.f32.mrf.mxu1  ;;  %3340 = vmatprep.subr.mxu0 %v4182_v20 }
 0x27a   : > { %3266 = vmatprep.mubr.msk.f32.mxu0 %vm628_vm1, %v1292_v60  ;;  %3341 = vmatpush3.msra.mxu0 %v4182_v20 }
 0x27b   : > { %v3214_v61 = vpop.f32.mrf.mxu1  ;;  %3267 = vmatmul.mubr.msk.f32.gmra.mxu0 %vm628_vm1, %v3211_v58  ;;  %3360 = vmatprep.subr.mxu0 %v2345_v59 }
 0x27d   : > { %v1302_v62 = vpop.f32.mrf.mxu1 }
 0x27e   : > { %3269 = vmatprep.mubr.msk.f32.mxu0 %vm628_vm1, %v1302_v62 }
 0x27f   : > { %v3217_v63 = vpop.f32.mrf.mxu1  ;;  %3270 = vmatmul.mubr.msk.f32.gmra.mxu0 %vm628_vm1, %v3214_v61 }
 0x281   : > { %v1312_v0 = vpop.f32.mrf.mxu1 }
 0x282   : > { %3272 = vmatprep.mubr.msk.f32.mxu0 %vm628_vm1, %v1312_v0 }
 0x283   : > { %v3220_v16 = vpop.f32.mrf.mxu1  ;;  %3273 = vmatmul.mubr.msk.f32.gmra.mxu0 %vm628_vm1, %v3217_v63 }
 0x285   : > { %v1322_v1 = vpop.f32.mrf.mxu1 }
 0x286   : > { %3275 = vmatprep.mubr.msk.f32.mxu0 %vm628_vm1, %v1322_v1 }
 0x287   : > { %3276 = vmatmul.mubr.msk.f32.gmra.mxu0 %vm628_vm1, %v3220_v16  ;;  %v3304_v20 = vpop.f32.mrf.mxu1 }
 0x289   : > { %v2037_v3 = vpop.f32.mrf.mxu1 }
 0x28a   : > { %3342 = vmatprep.mubr.msk.f32.mxu0 %vm628_vm1, %v2037_v3 }
 0x28b   : > { %v3307_v2 = vpop.f32.mrf.mxu1  ;;  %3343 = vmatmul.mubr.msk.f32.vlgmr.msra.gmra.mxu0 %vm628_vm1, %v3304_v20 }
 0x28c   : > { %3361 = vmatpush3.msra.mxu0 %v2345_v59 }
 0x28d   : > { %v2047_v4 = vpop.f32.mrf.mxu1  ;;  %3362 = vmatprep.subr.mxu0 %v2344_v5 }
 0x28e   : > { %3345 = vmatprep.mubr.msk.f32.mxu0 %vm628_vm1, %v2047_v4  ;;  %3363 = vmatpush3.msra.mxu0 %v2344_v5 }
 0x28f   : > { %v3310_v6 = vpop.f32.mrf.mxu1  ;;  %3346 = vmatmul.mubr.msk.f32.gmra.mxu0 %vm628_vm1, %v3307_v2 }
 0x291   : > { %v2057_v7 = vpop.f32.mrf.mxu1 }
 0x292   : > { %3348 = vmatprep.mubr.msk.f32.mxu0 %vm628_vm1, %v2057_v7 }
 0x293   : > { %v3313_v8 = vpop.f32.mrf.mxu1  ;;  %3349 = vmatmul.mubr.msk.f32.gmra.mxu0 %vm628_vm1, %v3310_v6 }
 0x295   : > { %v2067_v10 = vpop.f32.mrf.mxu1 }
 0x296   : > { %3351 = vmatprep.mubr.msk.f32.mxu0 %vm628_vm1, %v2067_v10 }
 0x297   : > { %v3316_v11 = vpop.f32.mrf.mxu1  ;;  %3352 = vmatmul.mubr.msk.f32.gmra.mxu0 %vm628_vm1, %v3313_v8 }
 0x299   : > { %v2077_v12 = vpop.f32.mrf.mxu1 }
 0x29a   : > { %3354 = vmatprep.mubr.msk.f32.mxu1 %vm628_vm1, %v2077_v12 }
 0x29b   : > { %v3319_v13 = vpop.f32.mrf.mxu1  ;;  %3355 = vmatmul.mubr.msk.f32.vlgmr.msra.gmra.mxu1 %vm628_vm1, %v3316_v11 }
 0x29d   : > { %v2087_v14 = vpop.f32.mrf.mxu1 }
 0x29e   : > { %3357 = vmatprep.mubr.msk.f32.mxu1 %vm628_vm1, %v2087_v14 }
 0x29f   : > { %v3322_v15 = vpop.f32.mrf.mxu1  ;;  %3358 = vmatmul.mubr.msk.f32.gmra.mxu1 %vm628_vm1, %v3319_v13 }
 0x2a1   : > { %v2097_v17 = vpop.f32.mrf.mxu1 }
 0x2a2   : > { %3364 = vmatprep.mubr.msk.f32.mxu0 %vm628_vm1, %v2097_v17 }
 0x2a3   : > { %v3325_v18 = vpop.f32.mrf.mxu1  ;;  %3365 = vmatmul.mubr.msk.f32.vlgmr.msra.gmra.mxu0 %vm628_vm1, %v3322_v15 }
 0x2a5   : > { %v2107_v19 = vpop.f32.mrf.mxu1 }
 0x2a6   : > { %3367 = vmatprep.mubr.msk.f32.mxu0 %vm628_vm1, %v2107_v19 }
 0x2a7   : > { %v3328_v21 = vpop.f32.mrf.mxu1  ;;  %3368 = vmatmul.mubr.msk.f32.gmra.mxu0 %vm628_vm1, %v3325_v18 }
 0x2a9   : > { %v2117_v22 = vpop.f32.mrf.mxu1 }
 0x2aa   : > { %3370 = vmatprep.mubr.msk.f32.mxu0 %vm628_vm1, %v2117_v22 }
 0x2ab   : > { %v3331_v23 = vpop.f32.mrf.mxu1  ;;  %3371 = vmatmul.mubr.msk.f32.gmra.mxu0 %vm628_vm1, %v3328_v21 }
 0x2ad   : > { %v2127_v24 = vpop.f32.mrf.mxu1 }
 0x2ae   : > { %3373 = vmatprep.mubr.msk.f32.mxu0 %vm628_vm1, %v2127_v24 }
 0x2af   : > { %v3334_v25 = vpop.f32.mrf.mxu1  ;;  %3374 = vmatmul.mubr.msk.f32.gmra.mxu0 %vm628_vm1, %v3331_v23 }
 0x2b1   : > { %v2137_v26 = vpop.f32.mrf.mxu1 }
 0x2b2   : > { %3376 = vmatprep.mubr.msk.f32.mxu0 %vm628_vm1, %v2137_v26 }
 0x2b3   : > { %3377 = vmatmul.mubr.msk.f32.gmra.mxu0 %vm628_vm1, %v3334_v25  ;;  %v3337_v27 = vpop.f32.mrf.mxu1 }
 0x2b5   : > { %v2147_v28 = vpop.f32.mrf.mxu1 }
 0x2b6   : > { %3379 = vmatprep.mubr.msk.f32.mxu0 %vm628_vm1, %v2147_v28 }
 0x2b7   : > { %3380 = vmatmul.mubr.msk.f32.gmra.mxu0 %vm628_vm1, %v3337_v27 }
 0x30f   : > { %v3227_v29 = vpop.f32.mrf.mxu0 }
 0x310   : > { %v1477_v33 = vmul.f32 %v3227_v29, %v3227_v29 }
 0x311   : > { %v1427_v30 = vpop.f32.mrf.mxu0 }
 0x312   : > { %v1476_v36 = vmul.f32 %v1427_v30, %v1427_v30 }
 0x313   : > { %v3230_v31 = vpop.f32.mrf.mxu0 }
 0x314   : > { %v1481_v32 = vmul.f32 %v3230_v31, %v3227_v29  ;;  %v1479_v39 = vmul.f32 %v3230_v31, %v3230_v31 }
 0x315   : > { %v1437_v9 = vpop.f32.mrf.mxu0 }
 0x316   : > { %v1480_v34 = vmul.f32 %v1437_v9, %v1427_v30  ;;  %v1478_v43 = vmul.f32 %v1437_v9, %v1437_v9 }
 0x317   : > { %v3233_v35 = vpop.f32.mrf.mxu0 }
 0x318   : > { %v1483_v37 = vsub.f32 %v3233_v35, %v1477_v33 }
 0x319   : > { %v1447_v38 = vpop.f32.mrf.mxu0 }
 0x31a   : > { %v1482_v40 = vsub.f32 %v1447_v38, %v1476_v36 }
 0x31b   : > { %v3236_v41 = vpop.f32.mrf.mxu0 }
 0x31c   : > { %v1485_v44 = vsub.f32 %v3236_v41, %v1479_v39 }
 0x31d   : > { %v1457_v46 = vpop.f32.mrf.mxu0 }
 0x31e   : > { %v1493_v47 = vadd.f32 %v1485_v44, %v1483_v37  ;;  %v1484_v48 = vsub.f32 %v1457_v46, %v1478_v43 }
 0x31f   : > { %v3239_v49 = vpop.f32.mrf.mxu0 }
 0x320   : > { %v1495_v50 = vadd.f32 58.5225, %v1493_v47  ;;  %v1492_v51 = vadd.f32 %v1484_v48, %v1482_v40  ;;  %v1487_v52 = vsub.f32 %v3239_v49, %v1481_v32 }
 0x321   : > { %v1467_v53 = vpop.f32.mrf.mxu0 }
 0x322   : > { %3486 = vrcp.f32 %v1495_v50  ;;  %v1494_v54 = vadd.f32 58.5225, %v1492_v51  ;;  %v1486_v55 = vsub.f32 %v1467_v53, %v1480_v34  ;;  %v1489_v61 = vmul.f32 2.0, %v1487_v52 }
 0x323   : > { %v3246_v56 = vpop.f32.mrf.mxu0 }
 0x324   : > { %3488 = vrcp.f32 %v1494_v54  ;;  %v1488_v63 = vmul.f32 2.0, %v1486_v55  ;;  %v1491_v1 = vadd.f32 58.5225, %v1489_v61  ;;  %v1651_v20 = vmul.f32 %v3246_v56, %v3246_v56 }
 0x325   : > { %v1601_v57 = vpop.f32.mrf.mxu0 }
 0x326   : > { %v1490_v2 = vadd.f32 58.5225, %v1488_v63  ;;  %v1650_v4 = vmul.f32 %v1601_v57, %v1601_v57 }
 0x327   : > { %v3249_v58 = vpop.f32.mrf.mxu0 }
 0x328   : > { %v1655_v59 = vmul.f32 %v3249_v58, %v3246_v56  ;;  %v1653_v3 = vmul.f32 %v3249_v58, %v3249_v58 }
 0x329   : > { %v1611_v60 = vpop.f32.mrf.mxu0 }
 0x32a   : > { %v1654_v62 = vmul.f32 %v1611_v60, %v1601_v57  ;;  %v1652_v8 = vmul.f32 %v1611_v60, %v1611_v60 }
 0x32b   : > { %v3252_v0 = vpop.f32.mrf.mxu0 }
 0x32c   : > { %v1657_v10 = vsub.f32 %v3252_v0, %v1651_v20 }
 0x32d   : > { %v1621_v16 = vpop.f32.mrf.mxu0 }
 0x32e   : > { %v1656_v13 = vsub.f32 %v1621_v16, %v1650_v4 }
 0x32f   : > { %v3487_v5 = vpop.eup %3486  ;;  %v3255_v6 = vpop.f32.mrf.mxu0 }
 0x330   : > { %v1499_v7 = vmul.f32 %v3487_v5, %v1491_v1  ;;  %v1659_v11 = vsub.f32 %v3255_v6, %v1653_v3 }
 0x331   : > { %v3489_v12 = vpop.eup %3488  ;;  %v1631_v14 = vpop.f32.mrf.mxu0 }
 0x332   : > { %v1501_v15 = vmul.f32 %v1499_v7, %v4196_v42  ;;  %v1498_v17 = vmul.f32 %v3489_v12, %v1490_v2  ;;  %v1667_v18 = vadd.f32 %v1659_v11, %v1657_v10  ;;  %v1658_v19 = vsub.f32 %v1631_v14, %v1652_v8 }
 0x333   : > { %v3258_v21 = vpop.f32.mrf.mxu0 }
 0x334   : > { %v1500_v22 = vmul.f32 %v1498_v17, %v4198_v45  ;;  %v1669_v23 = vadd.f32 58.5225, %v1667_v18  ;;  %v1666_v24 = vadd.f32 %v1658_v19, %v1656_v13  ;;  %v1661_v25 = vsub.f32 %v3258_v21, %v1655_v59 }
 0x335   : > { %v1641_v26 = vpop.f32.mrf.mxu0 }
 0x336   : > { %3490 = vrcp.f32 %v1669_v23  ;;  %v1668_v27 = vadd.f32 58.5225, %v1666_v24  ;;  %v1660_v31 = vsub.f32 %v1641_v26, %v1654_v62  ;;  %v1663_v42 = vmul.f32 2.0, %v1661_v25 }
 0x337   : > { %v3265_v28 = vpop.f32.mrf.mxu0 }
 0x338   : > { %3492 = vrcp.f32 %v1668_v27  ;;  %v1662_v33 = vmul.f32 2.0, %v1660_v31  ;;  %v1665_v45 = vadd.f32 58.5225, %v1663_v42  ;;  %v1829_v35 = vmul.f32 %v3265_v28, %v3265_v28 }
 0x339   : > { %v4255_v29 = vpop.f32.mrf.mxu0 }
 0x33a   : > { %v1664_v40 = vadd.f32 58.5225, %v1662_v33  ;;  %v1828_v24 = vmul.f32 %v4255_v29, %v4255_v29 }
 0x33b   : > { %v3268_v30 = vpop.f32.mrf.mxu0 }
 0x33c   : > { %v1831_v36 = vmul.f32 %v3268_v30, %v3268_v30  ;;  %v1833_v58 = vmul.f32 %v3268_v30, %v3265_v28 }
 0x33d   : > { %v4257_v32 = vpop.f32.mrf.mxu0 }
 0x33e   : > { %v1830_v18 = vmul.f32 %v4257_v32, %v4257_v32 }
 0x33f   : > { %v3271_v9 = vpop.f32.mrf.mxu0 }
 0x340   : > { %v1835_v41 = vsub.f32 %v3271_v9, %v1829_v35 }
 0x341   : > { %v4259_v34 = vpop.f32.mrf.mxu0 }
 0x342   : > { %v1834_v42 = vsub.f32 %v4259_v34, %v1828_v24 }
 0x343   : > { %v3491_v37 = vpop.eup %3490  ;;  %v3274_v38 = vpop.f32.mrf.mxu0 }
 0x344   : > { %v1673_v39 = vmul.f32 %v3491_v37, %v1665_v45  ;;  %v1837_v43 = vsub.f32 %v3274_v38, %v1831_v36 }
 0x345   : > { %v3493_v44 = vpop.eup %3492  ;;  %v1809_v46 = vpop.f32.mrf.mxu0 }
 0x346   : > { %v1675_v47 = vmul.f32 %v1673_v39, %v1673_v39  ;;  %v1672_v48 = vmul.f32 %v3493_v44, %v1664_v40  ;;  %v1845_v49 = vadd.f32 %v1837_v43, %v1835_v41  ;;  %v1836_v25 = vsub.f32 %v1809_v46, %v1830_v18 }
 0x347   : > { %v3277_v50 = vpop.f32.mrf.mxu0 }
 0x348   : > { %v1677_v51 = vmul.f32 %v1675_v47, %v1673_v39  ;;  %v1674_v52 = vmul.f32 %v1672_v48, %v1672_v48  ;;  %v1847_v53 = vadd.f32 58.5225, %v1845_v49  ;;  %v1839_v61 = vsub.f32 %v3277_v50, %v1833_v58 }
 0x349   : > { %v4261_v54 = vpop.f32.mrf.mxu0  ;;  %v1844_v36 = vadd.f32 %v1836_v25, %v1834_v42 }
 0x34a   : > { %v1676_v55 = vmul.f32 %v1674_v52, %v1672_v48  ;;  %3494 = vrcp.f32 %v1847_v53  ;;  %v1679_v56 = vmul.f32 %v1677_v51, %v1501_v15  ;;  %v1841_v0 = vmul.f32 2.0, %v1839_v61 }
 0x34b   : > { %v4263_v57 = vpop.f32.mrf.mxu0  ;;  %v1846_v46 = vadd.f32 58.5225, %v1844_v36 }
 0x34c   : > { %v4265_v59 = vmul.f32 %v1676_v55, %v1500_v22  ;;  %v1843_v1 = vadd.f32 58.5225, %v1841_v0  ;;  %v2316_v15 = vmul.f32 %v4263_v57, %v4263_v57 }
 0x34d   : > { %v4267_v60 = vpop.f32.mrf.mxu0 }
 0x34e   : > { %v2315_v19 = vmul.f32 %v4267_v60, %v4267_v60 }
 0x34f   : > { %v3347_v62 = vpop.f32.mrf.mxu0 }
 0x350   : > { %v2318_v12 = vmul.f32 %v3347_v62, %v3347_v62  ;;  %v2320_v55 = vmul.f32 %v3347_v62, %v4263_v57 }
 0x351   : > { %v2268_v63 = vpop.f32.mrf.mxu0 }
 0x352   : > { %v2317_v13 = vmul.f32 %v2268_v63, %v2268_v63  ;;  %v2319_v0 = vmul.f32 %v2268_v63, %v4267_v60 }
 0x353   : > { %v3350_v16 = vpop.f32.mrf.mxu0 }
 0x354   : > { %v2322_v23 = vsub.f32 %v3350_v16, %v2316_v15 }
 0x355   : > { %v2278_v5 = vpop.f32.mrf.mxu0 }
 0x356   : > { %v2321_v26 = vsub.f32 %v2278_v5, %v2315_v19 }
 0x357   : > { %v3495_v20 = vpop.eup %3494  ;;  %v3353_v6 = vpop.f32.mrf.mxu0 }
 0x358   : > { %v1851_v3 = vmul.f32 %v3495_v20, %v1843_v1  ;;  %v2324_v17 = vsub.f32 %v3353_v6, %v2318_v12  ;;  %v1832_v20 = vmul.f32 %v4257_v32, %v4255_v29 }
 0x359   : > { %v2288_v10 = vpop.f32.mrf.mxu0 }
 0x35a   : > { %v4269_v2 = vmul.f32 %v1851_v3, %v1679_v56  ;;  %v2323_v21 = vsub.f32 %v2288_v10, %v2317_v13  ;;  %v2332_v28 = vadd.f32 %v2324_v17, %v2322_v23  ;;  %v1838_v6 = vsub.f32 %v4261_v54, %v1832_v20 }
 0x35b   : > { %v4271_v4 = vpop.f32.mrf.mxu1 }
 0x35c   : > { %v2331_v9 = vadd.f32 %v2323_v21, %v2321_v26  ;;  %v2334_v39 = vadd.f32 58.5225, %v2332_v28  ;;  %v2326_v16 = vsub.f32 %v4271_v4, %v2320_v55  ;;  %v1840_v4 = vmul.f32 2.0, %v1838_v6 }
 0x35d   : > { %v4273_v7 = vpop.f32.mrf.mxu1 }
 0x35e   : > { %v2333_v40 = vadd.f32 58.5225, %v2331_v9  ;;  %3496 = vrcp.f32 %v2334_v39  ;;  %v2325_v3 = vsub.f32 %v4273_v7, %v2319_v0  ;;  %v2328_v62 = vmul.f32 2.0, %v2326_v16 }
 0x35f   : > { %v3359_v8 = vpop.f32.mrf.mxu1  ;;  %v1842_v23 = vadd.f32 58.5225, %v1840_v4 }
 0x360   : > { %3498 = vrcp.f32 %v2333_v40  ;;  %v2330_v15 = vadd.f32 58.5225, %v2328_v62 }
 0x361   : > { %v2308_v11 = vpop.f32.mrf.mxu1 }
 0x362   : > { %v2327_v11 = vmul.f32 2.0, %v2325_v3 }
 0x363   : > { %v3366_v14 = vpop.f32.mrf.mxu0 }
 0x364   : > { %v2508_v30 = vmul.f32 %v3366_v14, %v3366_v14 }
 0x365   : > { %v2448_v22 = vpop.f32.mrf.mxu0 }
 0x366   : > { %v2507_v37 = vmul.f32 %v2448_v22, %v2448_v22 }
 0x367   : > { %v3369_v27 = vpop.f32.mrf.mxu0 }
 0x368   : > { %v2510_v31 = vmul.f32 %v3369_v27, %v3369_v27  ;;  %v2512_v5 = vmul.f32 %v3369_v27, %v3366_v14  ;;  %v2329_v14 = vadd.f32 58.5225, %v2327_v11 }
 0x369   : > { %v2458_v33 = vpop.f32.mrf.mxu0 }
 0x36a   : > { %v2524_v45 = vadd.f32 %v2510_v31, %v2508_v30  ;;  %v2509_v35 = vmul.f32 %v2458_v33, %v2458_v33  ;;  %v2511_v8 = vmul.f32 %v2458_v33, %v2448_v22  ;;  %v2520_v12 = vmul.f32 2.0, %v2512_v5 }
 0x36b   : > { %v3372_v38 = vpop.f32.mrf.mxu0  ;;  %v3497_v63 = vpop.eup %3496 }
 0x36c   : > { %v2523_v41 = vadd.f32 %v2509_v35, %v2507_v37  ;;  %v2526_v44 = vadd.f32 6.5025, %v2524_v45  ;;  %v2514_v49 = vsub.f32 %v3372_v38, %v2508_v30  ;;  %v2519_v17 = vmul.f32 2.0, %v2511_v8 }
 0x36d   : > { %v2468_v43 = vpop.f32.mrf.mxu0  ;;  %v3499_v13 = vpop.eup %3498  ;;  %v2338_v7 = vmul.f32 %v3497_v63, %v2330_v15  ;;  %v2522_v19 = vadd.f32 6.5025, %v2520_v12 }
 0x36e   : > { %v2525_v48 = vadd.f32 6.5025, %v2523_v41  ;;  %3500 = vrcp.f32 %v2526_v44  ;;  %v2513_v51 = vsub.f32 %v2468_v43, %v2507_v37  ;;  %v2337_v24 = vmul.f32 %v3499_v13, %v2329_v14 }
 0x36f   : > { %v3375_v47 = vpop.f32.mrf.mxu0  ;;  %3502 = vrcp.f32 %v1846_v46  ;;  %v2521_v25 = vadd.f32 6.5025, %v2519_v17  ;;  %v2340_v30 = vmul.f32 %v2338_v7, %v2338_v7 }
 0x370   : > { %v2516_v50 = vsub.f32 %v3375_v47, %v2510_v31  ;;  %3504 = vrcp.f32 %v2525_v48  ;;  %v2339_v45 = vmul.f32 %v2337_v24, %v2337_v24 }
 0x371   : > { %v2478_v34 = vpop.f32.mrf.mxu0  ;;  %v2342_v40 = vmul.f32 %v2340_v30, %v4269_v2 }
 0x372   : > { %v2536_v52 = vadd.f32 %v2516_v50, %v2514_v49  ;;  %v2515_v53 = vsub.f32 %v2478_v34, %v2509_v35 }
 0x373   : > { %v3378_v61 = vpop.f32.mrf.mxu0 }
 0x374   : > { %v2538_v56 = vadd.f32 58.5225, %v2536_v52  ;;  %v2535_v58 = vadd.f32 %v2515_v53, %v2513_v51  ;;  %v2518_v10 = vsub.f32 %v3378_v61, %v2512_v5 }
 0x375   : > { %v2488_v57 = vpop.f32.mrf.mxu0 }
 0x376   : > { %3506 = vrcp.f32 %v2538_v56  ;;  %v2537_v1 = vadd.f32 58.5225, %v2535_v58  ;;  %v2517_v60 = vsub.f32 %v2488_v57, %v2511_v8  ;;  %v2532_v18 = vmul.f32 2.0, %v2518_v10 }
 0x377   : > { %v3381_v39 = vpop.f32.mrf.mxu0 }
 0x378   : > { %3508 = vrcp.f32 %v2537_v1  ;;  %v2531_v21 = vmul.f32 2.0, %v2517_v60  ;;  %v2534_v26 = vadd.f32 58.5225, %v2532_v18  ;;  %v2560_v53 = vmul.f32 0.16, %v3381_v39 }
 0x379   : > { %v2498_v50 = vpop.f32.mrf.mxu0 }
 0x37a   : > { %v2533_v9 = vadd.f32 58.5225, %v2531_v21  ;;  %v2559_v55 = vmul.f32 0.16, %v2498_v50  ;;  %v2562_v0 = vmul.f32 0.003921569, %v2560_v53 }
 0x37b   : > { %v3501_v29 = vpop.eup %3500 }
 0x37c   : > { %v3503_v32 = vpop.eup %3502  ;;  %v2530_v22 = vmul.f32 %v3501_v29, %v2522_v19  ;;  %v2561_v2 = vmul.f32 0.003921569, %v2559_v55 }
 0x37d   : > { %v3505_v54 = vpop.eup %3504  ;;  %v1850_v28 = vmul.f32 %v3503_v32, %v1842_v23 }
 0x37e   : > { %v2529_v31 = vmul.f32 %v3505_v54, %v2521_v25  ;;  %v2550_v35 = vmul.f32 %v2530_v22, %v2530_v22 }
 0x37f   : > { %v1852_v38 = vmul.f32 %v1850_v28, %v4265_v59 }
 0x380   : > { %v2549_v41 = vmul.f32 %v2529_v31, %v2529_v31  ;;  %v2552_v49 = vmul.f32 %v2550_v35, %v2530_v22 }
 0x381   : > { %v2341_v46 = vmul.f32 %v2339_v45, %v1852_v38 }
 0x382   : > { %v2551_v51 = vmul.f32 %v2549_v41, %v2529_v31 }
 0x383   : > { %v3507_v27 = vpop.eup %3506 }
 0x384   : > { %v2542_v42 = vmul.f32 %v3507_v27, %v2534_v26 }
 0x385   : > { %v3509_v33 = vpop.eup %3508 }
 0x386   : > { %v2544_v36 = vmul.f32 %v2542_v42, %v2542_v42  ;;  %v2541_v37 = vmul.f32 %v3509_v33, %v2533_v9 }
 0x388   : > { %v2546_v43 = vmul.f32 %v2544_v36, %v2542_v42  ;;  %v2543_v44 = vmul.f32 %v2541_v37, %v2541_v37 }
 0x38a   : > { %v2548_v47 = vmul.f32 %v2546_v43, %v2342_v40  ;;  %v2545_v48 = vmul.f32 %v2543_v44, %v2541_v37 }
 0x38c   : > { %v2547_v34 = vmul.f32 %v2545_v48, %v2341_v46  ;;  %v2554_v52 = vmul.f32 %v2552_v49, %v2548_v47 }
 0x38e   : > { %v2553_v56 = vmul.f32 %v2551_v51, %v2547_v34  ;;  %v2556_v58 = vsub.f32 1.0, %v2554_v52 }
 0x390   : > { %v2555_v61 = vsub.f32 1.0, %v2553_v56  ;;  %v2558_v59 = vmul.f32 0.84, %v2556_v58 }
 0x392   : > { %v2557_v16 = vmul.f32 0.84, %v2555_v61  ;;  %v2564_v20 = vadd.f32 %v2562_v0, %v2558_v59 }
 0x394   : > { %v2563_v1 = vadd.f32 %v2561_v2, %v2557_v16  ;;  %v2566_v6 = vmul.f32 200.0, %v2564_v20 }
 0x396   : > { %v2565_v3 = vmul.f32 200.0, %v2563_v1  ;;  %v2570_v57 = vsel %vm628_vm1, %v2566_v6, 0.0 }
 0x398   : > { %v2567_v5 = vsel %vm628_vm1, %v2565_v3, 0.0 }
 0x399   : > { %2568 = vadd.xlane.f32.xlu0 %v2567_v5 }
 0x39d   : > { %2571 = vadd.xlane.f32.xlu0 %v2570_v57 }
 0x422   : > { %v2569_v62 = vpop.xlane.xlu0 %2568 }
 0x426   : > { %v2572_v8 = vpop.xlane.xlu0 %2571 }
 0x427   : > { %v2573_v10 = vadd.f32 %v2572_v8, %v2569_v62 }
 0x429   : > { %v2574_v11 = vrot.slane %v2573_v10, 4 }
 0x42b   : > { %v2575_v12 = vadd.f32 %v2574_v11, %v2573_v10 }
 0x42d   : > { %v2576_v60 = vrot.slane %v2575_v12, 2 }
 0x42f   : > { %v2577_v63 = vadd.f32 %v2576_v60, %v2575_v12 }
 0x431   : > { %v2578_v4 = vrot.slane %v2577_v63, 1 }
 0x433   : > { %v2579_v13 = vadd.f32 %v2578_v4, %v2577_v63 }
 0x435   : > { %2581 = vst.msk [vmem:[%s365_s13] sm:$0x1] %vm2580_vm3, %v2579_v13 }
 0x436 PF: > { %p21_p7 = scmp.ge.s32.totalorder %s3855_s30, 4   ;;  %s4334_s21 = smov %s3712_s22 }
 0x437   : > { %s4335_s22 = smov %s3716_s23  ;;  %s4336_s23 = smov %s3866_s15 }
 0x438   : > { %s4337_s24 = smov %s3855_s30  ;;  %23 = sbr.rel (!%p21_p7) target bundleno = 7 (0x7), region = 121 }
 0x43d   :  { %2599 = vsyncpa [#allocation3], 1 }
 0x43e   :  { %2601 = vsyncpa [#allocation3 + $0x1], 1 }
 0x43f   :  { %2602 = vsyncpa [#allocation5], 1 }
 0x440   :  { %2604 = vsyncpa [#allocation5 + $0x1], 1 }
 0x441   :  { %2605 = vsyncpa [#allocation8], 1 }
 0x442   :  { %2606 = vsyncpa [#allocation11], 1 }

</bundles_post_ra>
